<compile_context>
chip_gen: v7x
topology: tpu7x:2x2x1
jax: 0.10.0
libtpu: 0.0.40
codegen_flags: <defaults>
</compile_context>

<pallas_src>
import math
import random
from functools import partial

import jax
import jax.numpy as jnp
from jax.experimental import pallas as pl
from jax.experimental.pallas import tpu as pltpu

VMEM_SPEC = pl.BlockSpec(memory_space=pltpu.MemorySpace.VMEM)

D_PAD = 128          # lane-dense hidden width (real dim_hidden zero-padded up to this)
PROJ_PAD = 2 * D_PAD  # fused projection width: [GCN | Q | V | 0] ++ [0 | K | 0]


# ------------------------- fused Pallas kernel -------------------------

def _gps_nas_fused_kernel(x_ref, a_ref,
                          enc_w_ref, enc_b_ref, pre_w_ref, pre_b_ref,
                          w_big_ref, b_qkv_ref, gcn_b_ref, wo_ref, bo_ref,
                          s1l_ref, t1l_ref, s1a_ref, t1a_ref,
                          ffw1_ref, ffb1_ref, ffw2_ref, ffb2_ref,
                          s2_ref, t2_ref,
                          head_w_ref, head_b_ref,
                          o_ref, *, num_layers, num_heads, dim_h, dh):
    f32, bf16 = jnp.float32, jnp.bfloat16

    # ---- FeatureEncoder: Linear(dim_in -> D) ----
    x = x_ref[...].astype(bf16)
    h = jnp.dot(x, enc_w_ref[...], preferred_element_type=f32) + enc_b_ref[...]

    # ---- pre_mp: Linear(D -> D) + ReLU ----
    h = jnp.dot(h.astype(bf16), pre_w_ref[...], preferred_element_type=f32) + pre_b_ref[...]
    h = jnp.maximum(h, 0.0)

    n = h.shape[0]
    a = a_ref[...].astype(bf16)
    inv_sqrt_dh = 1.0 / math.sqrt(dh)            # scale uses the REAL head dim

    # constant lane masks (built once, reused by every layer)
    lane = jax.lax.broadcasted_iota(jnp.int32, (1, D_PAD), 1)
    gcn_mask = (lane < dim_h).astype(f32)
    q_masks = [((lane >= dim_h + hd * dh) & (lane < dim_h + (hd + 1) * dh)).astype(f32)
               for hd in range(num_heads)]
    v_masks = [((lane >= 2 * dim_h + hd * dh) & (lane < 2 * dim_h + (hd + 1) * dh)).astype(f32)
               for hd in range(num_heads)]

    for l in range(num_layers):                  # statically unrolled, num_layers <= 3
        h_in = h
        h_in_bf = h_in.astype(bf16)

        # ---- fused GCN/Q/K/V projection: one [N,128] x [128,256] matmul ----
        proj = jnp.dot(h_in_bf, w_big_ref[l], preferred_element_type=f32) + b_qkv_ref[l]
        t0 = proj[:, :D_PAD]     # lanes: 0..dim_h-1 GCN, dim_h..2*dim_h-1 Q, 2*dim_h..3*dim_h-1 V
        t1 = proj[:, D_PAD:]     # lanes: dim_h..2*dim_h-1 K (lane-aligned with Q)

        # ---- local GCN branch:  A @ (h_in @ W_gcn) + b, residual, BatchNorm1d(eval) ----
        gcn_pre = (t0 * gcn_mask).astype(bf16)
        h_local = jnp.dot(a, gcn_pre, preferred_element_type=f32) + gcn_b_ref[l]
        h_local = h_in + h_local                 # dropout(eval)=identity, residual
        h_local = h_local * s1l_ref[l] + t1l_ref[l]

        # ---- global multi-head self-attention branch (per-head lane masks) ----
        ctx = jnp.zeros((n, D_PAD), f32)
        for hd in range(num_heads):
            q_h = t0 * q_masks[hd]                                    # head-h Q lanes only
            s_h = jnp.einsum('nf,mf->nm', q_h, t1,
                             preferred_element_type=f32) * inv_sqrt_dh
            s_h = s_h - jnp.max(s_h, axis=-1, keepdims=True)
            p_h = jnp.exp(s_h)
            p_h = p_h / jnp.sum(p_h, axis=-1, keepdims=True)          # exact softmax
            v_h = t0 * v_masks[hd]                                    # head-h V lanes only
            ctx = ctx + jnp.dot(p_h, v_h, preferred_element_type=f32)
        # heads land in disjoint lanes of ctx -> one packed output projection (= concat @ Wo)
        h_attn = jnp.dot(ctx.astype(bf16), wo_ref[l],
                         preferred_element_type=f32) + bo_ref[l]
        h_attn = h_in + h_attn
        h_attn = h_attn * s1a_ref[l] + t1a_ref[l]

        h = h_local + h_attn

        # ---- feed-forward block: D -> 2D -> D (ReLU), residual, BatchNorm1d(eval) ----
        ff = jnp.dot(h.astype(bf16), ffw1_ref[l], preferred_element_type=f32) + ffb1_ref[l]
        ff = jnp.maximum(ff, 0.0)
        ff = jnp.dot(ff.astype(bf16), ffw2_ref[l], preferred_element_type=f32) + ffb2_ref[l]
        h = h + ff
        h = h * s2_ref[l] + t2_ref[l]

    # ---- post_mp graph head: global mean pool over nodes + Linear ----
    pooled = jnp.mean(h, axis=0, keepdims=True)                       # [1, D_PAD]
    out = jnp.dot(pooled.astype(bf16), head_w_ref[...],
                  preferred_element_type=f32) + head_b_ref[...]
    o_ref[...] = out.astype(o_ref.dtype)


def gps_nas_forward(x_pad, a_norm, params, num_layers, num_heads, dim_h, dh, dim_out):
    args = (x_pad, a_norm,
            params["enc_w"], params["enc_b"], params["pre_w"], params["pre_b"],
            params["w_big"], params["b_qkv"], params["gcn_b"],
            params["wo"], params["bo"],
            params["s1l"], params["t1l"], params["s1a"], params["t1a"],
            params["ffw1"], params["ffb1"], params["ffw2"], params["ffb2"],
            params["s2"], params["t2"],
            params["head_w"], params["head_b"])
    out_padded = pl.pallas_call(
        partial(_gps_nas_fused_kernel, num_layers=num_layers,
                num_heads=num_heads, dim_h=dim_h, dh=dh),
        out_shape=jax.ShapeDtypeStruct((1, D_PAD), jnp.float32),
        in_specs=[VMEM_SPEC] * len(args),
        out_specs=VMEM_SPEC,
    )(*args)
    return out_padded[:, :dim_out]     # drop zero-padded output lanes


# ------------------------- parameters (raw + packed) -------------------------

def make_raw_params(key, dim_in, dim_h, dim_out, num_layers):
    """True-size f32 parameters (the 'PyTorch' view)."""
    def nrm(k, shape, s=0.1):
        return jax.random.normal(k, shape, jnp.float32) * s

    keys = iter(jax.random.split(key, 3 + 7 * num_layers))
    raw = {
        "enc_w": nrm(next(keys), (dim_in, dim_h)),
        "pre_w": nrm(next(keys), (dim_h, dim_h)),
        "head_w": nrm(next(keys), (dim_h, dim_out)),
        "layers": [],
    }
    for _ in range(num_layers):
        raw["layers"].append(dict(
            gcn_w=nrm(next(keys), (dim_h, dim_h)),
            wq=nrm(next(keys), (dim_h, dim_h)),
            wk=nrm(next(keys), (dim_h, dim_h)),
            wv=nrm(next(keys), (dim_h, dim_h)),
            wo=nrm(next(keys), (dim_h, dim_h)),
            ff1=nrm(next(keys), (dim_h, 2 * dim_h)),
            ff2=nrm(next(keys), (2 * dim_h, dim_h)),
        ))
    return raw


def pack_params(raw, dim_h, num_heads):
    """Zero-pad to lane-dense widths, pack GCN/Q/V/K into one fused [128,256] weight per
    layer, pack Wo so the lane-resident per-head contexts project in one matmul, cast all
    weights to bf16, and stack per-layer tensors along a leading L axis."""
    assert 3 * dim_h <= D_PAD, "Q/V packing needs 3*dim_h <= 128"
    f32, bf16 = jnp.float32, jnp.bfloat16
    eps = 1e-5
    # BatchNorm1d eval (running_mean=0, running_var=1, gamma=1, beta=0) folded:
    # scale = 1/sqrt(1+eps), shift = 0 (padded lanes stay zero under pure scaling).
    bn_scale = jnp.full((1, D_PAD), 1.0 / math.sqrt(1.0 + eps), f32)
    zeros_d = jnp.zeros((1, D_PAD), f32)

    def pad2(w, rows, cols):
        return jnp.zeros((rows, cols), f32).at[:w.shape[0], :w.shape[1]].set(w)

    q_off, v_off, k_off = dim_h, 2 * dim_h, D_PAD + dim_h

    p = {
        "enc_w": pad2(raw["enc_w"], D_PAD, D_PAD).astype(bf16),
        "enc_b": zeros_d,
        "pre_w": pad2(raw["pre_w"], D_PAD, D_PAD).astype(bf16),
        "pre_b": zeros_d,
        "head_w": pad2(raw["head_w"], D_PAD, D_PAD).astype(bf16),
        "head_b": zeros_d,
    }

    names = ["w_big", "b_qkv", "gcn_b", "wo", "bo", "s1l", "t1l", "s1a", "t1a",
             "ffw1", "ffb1", "ffw2", "ffb2", "s2", "t2"]
    per = {k: [] for k in names}

    for lp in raw["layers"]:
        wb = jnp.zeros((D_PAD, PROJ_PAD), f32)
        wb = wb.at[:dim_h, 0:dim_h].set(lp["gcn_w"])                  # GCN  -> tile0 lanes 0..dim_h-1
        wb = wb.at[:dim_h, q_off:q_off + dim_h].set(lp["wq"])         # Q    -> tile0 lanes dim_h..2dim_h-1
        wb = wb.at[:dim_h, v_off:v_off + dim_h].set(lp["wv"])         # V    -> tile0 lanes 2dim_h..3dim_h-1
        wb = wb.at[:dim_h, k_off:k_off + dim_h].set(lp["wk"])         # K    -> tile1, lane-aligned with Q
        per["w_big"].append(wb.astype(bf16))
        per["b_qkv"].append(jnp.zeros((1, PROJ_PAD), f32))            # Q/K/V biases (zero); GCN lanes MUST be 0
        per["gcn_b"].append(zeros_d)                                  # GCN bias added after A @ (.)

        wop = jnp.zeros((D_PAD, D_PAD), f32)
        wop = wop.at[v_off:v_off + dim_h, :dim_h].set(lp["wo"])       # ctx lives in lanes 2dim_h..3dim_h-1
        per["wo"].append(wop.astype(bf16))
        per["bo"].append(zeros_d)

        per["s1l"].append(bn_scale); per["t1l"].append(zeros_d)
        per["s1a"].append(bn_scale); per["t1a"].append(zeros_d)
        per["ffw1"].append(pad2(lp["ff1"], D_PAD, D_PAD).astype(bf16))
        per["ffb1"].append(zeros_d)
        per["ffw2"].append(pad2(lp["ff2"], D_PAD, D_PAD).astype(bf16))
        per["ffb2"].append(zeros_d)
        per["s2"].append(bn_scale); per["t2"].append(zeros_d)

    for k, v in per.items():
        p[k] = jnp.stack(v)     # leading layer axis [L, ...]
    return p


# ------------------------- pure-JAX reference (f32) -------------------------

def ref_forward(x, a, raw, num_heads):
    eps = 1e-5
    bn = lambda t: t / jnp.sqrt(1.0 + eps)
    h = x @ raw["enc_w"]
    h = jnp.maximum(h @ raw["pre_w"], 0.0)
    dim_h = h.shape[1]
    dh = dim_h // num_heads
    for lp in raw["layers"]:
        h_in = h
        h_local = bn(h_in + a @ (h_in @ lp["gcn_w"]))
        q, k, v = h_in @ lp["wq"], h_in @ lp["wk"], h_in @ lp["wv"]
        heads = []
        for hd in range(num_heads):
            qs = q[:, hd * dh:(hd + 1) * dh]
            ks = k[:, hd * dh:(hd + 1) * dh]
            vs = v[:, hd * dh:(hd + 1) * dh]
            p = jax.nn.softmax(qs @ ks.T / math.sqrt(dh), axis=-1)
            heads.append(p @ vs)
        h_attn = bn(h_in + jnp.concatenate(heads, axis=-1) @ lp["wo"])
        h = h_local + h_attn
        ff = jnp.maximum(h @ lp["ff1"], 0.0) @ lp["ff2"]
        h = bn(h + ff)
    pooled = jnp.mean(h, axis=0, keepdims=True)
    return pooled @ raw["head_w"]


# ------------------------- helpers -------------------------

def build_norm_adjacency(key, n):
    # random symmetric adjacency + self loops, GCN normalization D^-1/2 (A+I) D^-1/2
    a = (jax.random.uniform(key, (n, n)) < 0.25).astype(jnp.float32)
    a = jnp.maximum(a, a.T)
    a = a * (1.0 - jnp.eye(n)) + jnp.eye(n)
    deg = jnp.sum(a, axis=1)
    d_inv_sqrt = 1.0 / jnp.sqrt(deg)
    return a * d_inv_sqrt[:, None] * d_inv_sqrt[None, :]


# ------------------------- main -------------------------

if __name__ == "__main__":
    # NAS architecture sampling (deterministic stand-in for random.randint/choice)
    nas_rng = random.Random(0)
    GT_LAYERS = 3
    num_layers = nas_rng.randint(1, GT_LAYERS)
    # TODO(synk): choices restricted to GCN+Transformer (GAT/GINE/GENConv/Performer not implemented)
    layer_types = [(nas_rng.choice(["GCN"]), nas_rng.choice(["Transformer"]))
                   for _ in range(num_layers)]

    N = 16          # nodes
    DIM_IN = 4      # raw node feature dim
    DIM_H = 32      # cfg.gt.dim_hidden == cfg.gnn.dim_inner
    DIM_OUT = 8
    NUM_HEADS = 4
    DH = DIM_H // NUM_HEADS

    key = jax.random.PRNGKey(0)
    k_x, k_a, k_p = jax.random.split(key, 3)
    x = jax.random.normal(k_x, (N, DIM_IN), jnp.float32)
    a_norm = build_norm_adjacency(k_a, N)

    raw = make_raw_params(k_p, DIM_IN, DIM_H, DIM_OUT, num_layers)
    params = pack_params(raw, DIM_H, NUM_HEADS)

    x_pad = jnp.zeros((N, D_PAD), jnp.float32).at[:, :DIM_IN].set(x)

    out = gps_nas_forward(x_pad, a_norm, params, num_layers, NUM_HEADS, DIM_H, DH, DIM_OUT)
    out = jax.block_until_ready(out)

    assert out.shape == (1, DIM_OUT)
    assert bool(jnp.all(jnp.isfinite(out)))

    # loose check vs. f32 reference (bf16 weights give ~1e-2 relative deviation)
    ref = ref_forward(x, a_norm, raw, NUM_HEADS)
    assert bool(jnp.allclose(out, ref, rtol=5e-2, atol=5e-2)), (out, ref)

    print("KERNEL_OK")
</pallas_src>

<mosaic_0001>
module attributes {stable_mosaic.version = 11 : i64} {
  func.func @_gps_nas_fused_kernel(%arg0: memref<16x128xf32, #tpu.memory_space<vmem>>, %arg1: memref<16x16xf32, #tpu.memory_space<vmem>>, %arg2: memref<128x128xbf16, #tpu.memory_space<vmem>>, %arg3: memref<1x128xf32, #tpu.memory_space<vmem>>, %arg4: memref<128x128xbf16, #tpu.memory_space<vmem>>, %arg5: memref<1x128xf32, #tpu.memory_space<vmem>>, %arg6: memref<2x128x256xbf16, #tpu.memory_space<vmem>>, %arg7: memref<2x1x256xf32, #tpu.memory_space<vmem>>, %arg8: memref<2x1x128xf32, #tpu.memory_space<vmem>>, %arg9: memref<2x128x128xbf16, #tpu.memory_space<vmem>>, %arg10: memref<2x1x128xf32, #tpu.memory_space<vmem>>, %arg11: memref<2x1x128xf32, #tpu.memory_space<vmem>>, %arg12: memref<2x1x128xf32, #tpu.memory_space<vmem>>, %arg13: memref<2x1x128xf32, #tpu.memory_space<vmem>>, %arg14: memref<2x1x128xf32, #tpu.memory_space<vmem>>, %arg15: memref<2x128x128xbf16, #tpu.memory_space<vmem>>, %arg16: memref<2x1x128xf32, #tpu.memory_space<vmem>>, %arg17: memref<2x128x128xbf16, #tpu.memory_space<vmem>>, %arg18: memref<2x1x128xf32, #tpu.memory_space<vmem>>, %arg19: memref<2x1x128xf32, #tpu.memory_space<vmem>>, %arg20: memref<2x1x128xf32, #tpu.memory_space<vmem>>, %arg21: memref<128x128xbf16, #tpu.memory_space<vmem>>, %arg22: memref<1x128xf32, #tpu.memory_space<vmem>>, %arg23: memref<1x128xf32, #tpu.memory_space<vmem>>) attributes {dimension_semantics = [], scalar_prefetch = 0 : i64, scratch_operands = 0 : i64, tpu.core_type = #tpu.core_type<tc>} {
    %c0 = arith.constant 0 : index
    %c0_0 = arith.constant 0 : index
    %0 = vector.load %arg0[%c0, %c0_0] : memref<16x128xf32, #tpu.memory_space<vmem>>, vector<16x128xf32>
    %1 = arith.truncf %0 : vector<16x128xf32> to vector<16x128xbf16>
    %c0_1 = arith.constant 0 : index
    %c0_2 = arith.constant 0 : index
    %2 = vector.load %arg2[%c0_1, %c0_2] : memref<128x128xbf16, #tpu.memory_space<vmem>>, vector<128x128xbf16>
    %cst = arith.constant dense<0.000000e+00> : vector<16x128xf32>
    %3 = tpu.matmul %1, %2, %cst {dimension_numbers = #tpu.dot_dimension_numbers<[1], [0], [0], [1], [0, 0, 1, 1], [], []>} : vector<16x128xbf16>, vector<128x128xbf16>, vector<16x128xf32> -> vector<16x128xf32>
    %c0_3 = arith.constant 0 : index
    %c0_4 = arith.constant 0 : index
    %4 = vector.load %arg3[%c0_3, %c0_4] : memref<1x128xf32, #tpu.memory_space<vmem>>, vector<1x128xf32>
    %5 = vector.broadcast %4 : vector<1x128xf32> to vector<16x128xf32>
    %6 = arith.addf %3, %5 : vector<16x128xf32>
    %7 = arith.truncf %6 : vector<16x128xf32> to vector<16x128xbf16>
    %c0_5 = arith.constant 0 : index
    %c0_6 = arith.constant 0 : index
    %8 = vector.load %arg4[%c0_5, %c0_6] : memref<128x128xbf16, #tpu.memory_space<vmem>>, vector<128x128xbf16>
    %cst_7 = arith.constant dense<0.000000e+00> : vector<16x128xf32>
    %9 = tpu.matmul %7, %8, %cst_7 {dimension_numbers = #tpu.dot_dimension_numbers<[1], [0], [0], [1], [0, 0, 1, 1], [], []>} : vector<16x128xbf16>, vector<128x128xbf16>, vector<16x128xf32> -> vector<16x128xf32>
    %c0_8 = arith.constant 0 : index
    %c0_9 = arith.constant 0 : index
    %10 = vector.load %arg5[%c0_8, %c0_9] : memref<1x128xf32, #tpu.memory_space<vmem>>, vector<1x128xf32>
    %11 = vector.broadcast %10 : vector<1x128xf32> to vector<16x128xf32>
    %12 = arith.addf %9, %11 : vector<16x128xf32>
    %cst_10 = arith.constant 0.000000e+00 : f32
    %13 = vector.broadcast %cst_10 : f32 to vector<16x128xf32>
    %14 = arith.maximumf %12, %13 : vector<16x128xf32>
    %c0_11 = arith.constant 0 : index
    %c0_12 = arith.constant 0 : index
    %15 = vector.load %arg1[%c0_11, %c0_12] : memref<16x16xf32, #tpu.memory_space<vmem>>, vector<16x16xf32>
    %16 = arith.truncf %15 : vector<16x16xf32> to vector<16x16xbf16>
    %17 = tpu.iota {dimensions = array<i32: 1>} : vector<1x128xi32>
    %c32_i32 = arith.constant 32 : i32
    %18 = vector.broadcast %c32_i32 : i32 to vector<1x128xi32>
    %19 = arith.cmpi slt, %17, %18 : vector<1x128xi32>
    %20 = arith.extui %19 : vector<1x128xi1> to vector<1x128xi32>
    %21 = arith.sitofp %20 : vector<1x128xi32> to vector<1x128xf32>
    %c32_i32_13 = arith.constant 32 : i32
    %22 = vector.broadcast %c32_i32_13 : i32 to vector<1x128xi32>
    %23 = arith.cmpi sge, %17, %22 : vector<1x128xi32>
    %c40_i32 = arith.constant 40 : i32
    %24 = vector.broadcast %c40_i32 : i32 to vector<1x128xi32>
    %25 = arith.cmpi slt, %17, %24 : vector<1x128xi32>
    %26 = arith.andi %23, %25 : vector<1x128xi1>
    %27 = arith.extui %26 : vector<1x128xi1> to vector<1x128xi32>
    %28 = arith.sitofp %27 : vector<1x128xi32> to vector<1x128xf32>
    %c40_i32_14 = arith.constant 40 : i32
    %29 = vector.broadcast %c40_i32_14 : i32 to vector<1x128xi32>
    %30 = arith.cmpi sge, %17, %29 : vector<1x128xi32>
    %c48_i32 = arith.constant 48 : i32
    %31 = vector.broadcast %c48_i32 : i32 to vector<1x128xi32>
    %32 = arith.cmpi slt, %17, %31 : vector<1x128xi32>
    %33 = arith.andi %30, %32 : vector<1x128xi1>
    %34 = arith.extui %33 : vector<1x128xi1> to vector<1x128xi32>
    %35 = arith.sitofp %34 : vector<1x128xi32> to vector<1x128xf32>
    %c48_i32_15 = arith.constant 48 : i32
    %36 = vector.broadcast %c48_i32_15 : i32 to vector<1x128xi32>
    %37 = arith.cmpi sge, %17, %36 : vector<1x128xi32>
    %c56_i32 = arith.constant 56 : i32
    %38 = vector.broadcast %c56_i32 : i32 to vector<1x128xi32>
    %39 = arith.cmpi slt, %17, %38 : vector<1x128xi32>
    %40 = arith.andi %37, %39 : vector<1x128xi1>
    %41 = arith.extui %40 : vector<1x128xi1> to vector<1x128xi32>
    %42 = arith.sitofp %41 : vector<1x128xi32> to vector<1x128xf32>
    %c56_i32_16 = arith.constant 56 : i32
    %43 = vector.broadcast %c56_i32_16 : i32 to vector<1x128xi32>
    %44 = arith.cmpi sge, %17, %43 : vector<1x128xi32>
    %c64_i32 = arith.constant 64 : i32
    %45 = vector.broadcast %c64_i32 : i32 to vector<1x128xi32>
    %46 = arith.cmpi slt, %17, %45 : vector<1x128xi32>
    %47 = arith.andi %44, %46 : vector<1x128xi1>
    %48 = arith.extui %47 : vector<1x128xi1> to vector<1x128xi32>
    %49 = arith.sitofp %48 : vector<1x128xi32> to vector<1x128xf32>
    %c64_i32_17 = arith.constant 64 : i32
    %50 = vector.broadcast %c64_i32_17 : i32 to vector<1x128xi32>
    %51 = arith.cmpi sge, %17, %50 : vector<1x128xi32>
    %c72_i32 = arith.constant 72 : i32
    %52 = vector.broadcast %c72_i32 : i32 to vector<1x128xi32>
    %53 = arith.cmpi slt, %17, %52 : vector<1x128xi32>
    %54 = arith.andi %51, %53 : vector<1x128xi1>
    %55 = arith.extui %54 : vector<1x128xi1> to vector<1x128xi32>
    %56 = arith.sitofp %55 : vector<1x128xi32> to vector<1x128xf32>
    %c72_i32_18 = arith.constant 72 : i32
    %57 = vector.broadcast %c72_i32_18 : i32 to vector<1x128xi32>
    %58 = arith.cmpi sge, %17, %57 : vector<1x128xi32>
    %c80_i32 = arith.constant 80 : i32
    %59 = vector.broadcast %c80_i32 : i32 to vector<1x128xi32>
    %60 = arith.cmpi slt, %17, %59 : vector<1x128xi32>
    %61 = arith.andi %58, %60 : vector<1x128xi1>
    %62 = arith.extui %61 : vector<1x128xi1> to vector<1x128xi32>
    %63 = arith.sitofp %62 : vector<1x128xi32> to vector<1x128xf32>
    %c80_i32_19 = arith.constant 80 : i32
    %64 = vector.broadcast %c80_i32_19 : i32 to vector<1x128xi32>
    %65 = arith.cmpi sge, %17, %64 : vector<1x128xi32>
    %c88_i32 = arith.constant 88 : i32
    %66 = vector.broadcast %c88_i32 : i32 to vector<1x128xi32>
    %67 = arith.cmpi slt, %17, %66 : vector<1x128xi32>
    %68 = arith.andi %65, %67 : vector<1x128xi1>
    %69 = arith.extui %68 : vector<1x128xi1> to vector<1x128xi32>
    %70 = arith.sitofp %69 : vector<1x128xi32> to vector<1x128xf32>
    %c88_i32_20 = arith.constant 88 : i32
    %71 = vector.broadcast %c88_i32_20 : i32 to vector<1x128xi32>
    %72 = arith.cmpi sge, %17, %71 : vector<1x128xi32>
    %c96_i32 = arith.constant 96 : i32
    %73 = vector.broadcast %c96_i32 : i32 to vector<1x128xi32>
    %74 = arith.cmpi slt, %17, %73 : vector<1x128xi32>
    %75 = arith.andi %72, %74 : vector<1x128xi1>
    %76 = arith.extui %75 : vector<1x128xi1> to vector<1x128xi32>
    %77 = arith.sitofp %76 : vector<1x128xi32> to vector<1x128xf32>
    %78 = arith.truncf %14 : vector<16x128xf32> to vector<16x128xbf16>
    %c0_21 = arith.constant 0 : index
    %c0_22 = arith.constant 0 : index
    %c0_23 = arith.constant 0 : index
    %79 = vector.load %arg6[%c0_21, %c0_22, %c0_23] : memref<2x128x256xbf16, #tpu.memory_space<vmem>>, vector<1x128x256xbf16>
    %80 = vector.shape_cast %79 : vector<1x128x256xbf16> to vector<128x256xbf16>
    %cst_24 = arith.constant dense<0.000000e+00> : vector<16x256xf32>
    %81 = tpu.matmul %78, %80, %cst_24 {dimension_numbers = #tpu.dot_dimension_numbers<[1], [0], [0], [1], [0, 0, 1, 1], [], []>} : vector<16x128xbf16>, vector<128x256xbf16>, vector<16x256xf32> -> vector<16x256xf32>
    %c0_25 = arith.constant 0 : index
    %c0_26 = arith.constant 0 : index
    %c0_27 = arith.constant 0 : index
    %82 = vector.load %arg7[%c0_25, %c0_26, %c0_27] : memref<2x1x256xf32, #tpu.memory_space<vmem>>, vector<1x1x256xf32>
    %83 = vector.shape_cast %82 : vector<1x1x256xf32> to vector<1x256xf32>
    %84 = vector.broadcast %83 : vector<1x256xf32> to vector<16x256xf32>
    %85 = arith.addf %81, %84 : vector<16x256xf32>
    %86 = vector.extract_strided_slice %85 {offsets = [0, 0], sizes = [16, 128], strides = [1, 1]} : vector<16x256xf32> to vector<16x128xf32>
    %87 = vector.extract_strided_slice %85 {offsets = [0, 128], sizes = [16, 128], strides = [1, 1]} : vector<16x256xf32> to vector<16x128xf32>
    %88 = vector.broadcast %21 : vector<1x128xf32> to vector<16x128xf32>
    %89 = arith.mulf %86, %88 : vector<16x128xf32>
    %90 = arith.truncf %89 : vector<16x128xf32> to vector<16x128xbf16>
    %cst_28 = arith.constant dense<0.000000e+00> : vector<16x128xf32>
    %91 = tpu.matmul %16, %90, %cst_28 {dimension_numbers = #tpu.dot_dimension_numbers<[1], [0], [0], [1], [0, 0, 1, 1], [], []>} : vector<16x16xbf16>, vector<16x128xbf16>, vector<16x128xf32> -> vector<16x128xf32>
    %c0_29 = arith.constant 0 : index
    %c0_30 = arith.constant 0 : index
    %c0_31 = arith.constant 0 : index
    %92 = vector.load %arg8[%c0_29, %c0_30, %c0_31] : memref<2x1x128xf32, #tpu.memory_space<vmem>>, vector<1x1x128xf32>
    %93 = vector.shape_cast %92 : vector<1x1x128xf32> to vector<1x128xf32>
    %94 = vector.broadcast %93 : vector<1x128xf32> to vector<16x128xf32>
    %95 = arith.addf %91, %94 : vector<16x128xf32>
    %96 = arith.addf %14, %95 : vector<16x128xf32>
    %c0_32 = arith.constant 0 : index
    %c0_33 = arith.constant 0 : index
    %c0_34 = arith.constant 0 : index
    %97 = vector.load %arg11[%c0_32, %c0_33, %c0_34] : memref<2x1x128xf32, #tpu.memory_space<vmem>>, vector<1x1x128xf32>
    %98 = vector.shape_cast %97 : vector<1x1x128xf32> to vector<1x128xf32>
    %99 = vector.broadcast %98 : vector<1x128xf32> to vector<16x128xf32>
    %100 = arith.mulf %96, %99 : vector<16x128xf32>
    %c0_35 = arith.constant 0 : index
    %c0_36 = arith.constant 0 : index
    %c0_37 = arith.constant 0 : index
    %101 = vector.load %arg12[%c0_35, %c0_36, %c0_37] : memref<2x1x128xf32, #tpu.memory_space<vmem>>, vector<1x1x128xf32>
    %102 = vector.shape_cast %101 : vector<1x1x128xf32> to vector<1x128xf32>
    %103 = vector.broadcast %102 : vector<1x128xf32> to vector<16x128xf32>
    %104 = arith.addf %100, %103 : vector<16x128xf32>
    %cst_38 = arith.constant 0.000000e+00 : f32
    %105 = vector.broadcast %cst_38 : f32 to vector<16x128xf32>
    %106 = vector.broadcast %28 : vector<1x128xf32> to vector<16x128xf32>
    %107 = arith.mulf %86, %106 : vector<16x128xf32>
    "tpu.trace_start"() <{level = 10 : i32, message = "nf,mf->nm"}> : () -> ()
    %cst_39 = arith.constant dense<0.000000e+00> : vector<16x16xf32>
    %108 = tpu.matmul %107, %87, %cst_39 {dimension_numbers = #tpu.dot_dimension_numbers<[1], [1], [0], [0], [0, 0, 1, 0], [], []>} : vector<16x128xf32>, vector<16x128xf32>, vector<16x16xf32> -> vector<16x16xf32>
    "tpu.trace_stop"() : () -> ()
    %cst_40 = arith.constant 0.353553385 : f32
    %109 = vector.broadcast %cst_40 : f32 to vector<16x16xf32>
    %110 = arith.mulf %108, %109 : vector<16x16xf32>
    %cst_41 = arith.constant dense<0xFF800000> : vector<16xf32>
    %111 = vector.multi_reduction <maximumf>, %110, %cst_41 [1] : vector<16x16xf32> to vector<16xf32>
    %112 = vector.shape_cast %111 : vector<16xf32> to vector<16x1xf32>
    %113 = vector.broadcast %112 : vector<16x1xf32> to vector<16x16xf32>
    %114 = arith.subf %110, %113 : vector<16x16xf32>
    %115 = math.exp %114 : vector<16x16xf32>
    %cst_42 = arith.constant dense<0.000000e+00> : vector<16xf32>
    %116 = vector.multi_reduction <add>, %115, %cst_42 [1] : vector<16x16xf32> to vector<16xf32>
    %117 = vector.shape_cast %116 : vector<16xf32> to vector<16x1xf32>
    %118 = vector.broadcast %117 : vector<16x1xf32> to vector<16x16xf32>
    %119 = arith.divf %115, %118 : vector<16x16xf32>
    %120 = vector.broadcast %56 : vector<1x128xf32> to vector<16x128xf32>
    %121 = arith.mulf %86, %120 : vector<16x128xf32>
    %cst_43 = arith.constant dense<0.000000e+00> : vector<16x128xf32>
    %122 = tpu.matmul %119, %121, %cst_43 {dimension_numbers = #tpu.dot_dimension_numbers<[1], [0], [0], [1], [0, 0, 1, 1], [], []>} : vector<16x16xf32>, vector<16x128xf32>, vector<16x128xf32> -> vector<16x128xf32>
    %123 = arith.addf %105, %122 : vector<16x128xf32>
    %124 = vector.broadcast %35 : vector<1x128xf32> to vector<16x128xf32>
    %125 = arith.mulf %86, %124 : vector<16x128xf32>
    "tpu.trace_start"() <{level = 10 : i32, message = "nf,mf->nm"}> : () -> ()
    %cst_44 = arith.constant dense<0.000000e+00> : vector<16x16xf32>
    %126 = tpu.matmul %125, %87, %cst_44 {dimension_numbers = #tpu.dot_dimension_numbers<[1], [1], [0], [0], [0, 0, 1, 0], [], []>} : vector<16x128xf32>, vector<16x128xf32>, vector<16x16xf32> -> vector<16x16xf32>
    "tpu.trace_stop"() : () -> ()
    %cst_45 = arith.constant 0.353553385 : f32
    %127 = vector.broadcast %cst_45 : f32 to vector<16x16xf32>
    %128 = arith.mulf %126, %127 : vector<16x16xf32>
    %cst_46 = arith.constant dense<0xFF800000> : vector<16xf32>
    %129 = vector.multi_reduction <maximumf>, %128, %cst_46 [1] : vector<16x16xf32> to vector<16xf32>
    %130 = vector.shape_cast %129 : vector<16xf32> to vector<16x1xf32>
    %131 = vector.broadcast %130 : vector<16x1xf32> to vector<16x16xf32>
    %132 = arith.subf %128, %131 : vector<16x16xf32>
    %133 = math.exp %132 : vector<16x16xf32>
    %cst_47 = arith.constant dense<0.000000e+00> : vector<16xf32>
    %134 = vector.multi_reduction <add>, %133, %cst_47 [1] : vector<16x16xf32> to vector<16xf32>
    %135 = vector.shape_cast %134 : vector<16xf32> to vector<16x1xf32>
    %136 = vector.broadcast %135 : vector<16x1xf32> to vector<16x16xf32>
    %137 = arith.divf %133, %136 : vector<16x16xf32>
    %138 = vector.broadcast %63 : vector<1x128xf32> to vector<16x128xf32>
    %139 = arith.mulf %86, %138 : vector<16x128xf32>
    %cst_48 = arith.constant dense<0.000000e+00> : vector<16x128xf32>
    %140 = tpu.matmul %137, %139, %cst_48 {dimension_numbers = #tpu.dot_dimension_numbers<[1], [0], [0], [1], [0, 0, 1, 1], [], []>} : vector<16x16xf32>, vector<16x128xf32>, vector<16x128xf32> -> vector<16x128xf32>
    %141 = arith.addf %123, %140 : vector<16x128xf32>
    %142 = vector.broadcast %42 : vector<1x128xf32> to vector<16x128xf32>
    %143 = arith.mulf %86, %142 : vector<16x128xf32>
    "tpu.trace_start"() <{level = 10 : i32, message = "nf,mf->nm"}> : () -> ()
    %cst_49 = arith.constant dense<0.000000e+00> : vector<16x16xf32>
    %144 = tpu.matmul %143, %87, %cst_49 {dimension_numbers = #tpu.dot_dimension_numbers<[1], [1], [0], [0], [0, 0, 1, 0], [], []>} : vector<16x128xf32>, vector<16x128xf32>, vector<16x16xf32> -> vector<16x16xf32>
    "tpu.trace_stop"() : () -> ()
    %cst_50 = arith.constant 0.353553385 : f32
    %145 = vector.broadcast %cst_50 : f32 to vector<16x16xf32>
    %146 = arith.mulf %144, %145 : vector<16x16xf32>
    %cst_51 = arith.constant dense<0xFF800000> : vector<16xf32>
    %147 = vector.multi_reduction <maximumf>, %146, %cst_51 [1] : vector<16x16xf32> to vector<16xf32>
    %148 = vector.shape_cast %147 : vector<16xf32> to vector<16x1xf32>
    %149 = vector.broadcast %148 : vector<16x1xf32> to vector<16x16xf32>
    %150 = arith.subf %146, %149 : vector<16x16xf32>
    %151 = math.exp %150 : vector<16x16xf32>
    %cst_52 = arith.constant dense<0.000000e+00> : vector<16xf32>
    %152 = vector.multi_reduction <add>, %151, %cst_52 [1] : vector<16x16xf32> to vector<16xf32>
    %153 = vector.shape_cast %152 : vector<16xf32> to vector<16x1xf32>
    %154 = vector.broadcast %153 : vector<16x1xf32> to vector<16x16xf32>
    %155 = arith.divf %151, %154 : vector<16x16xf32>
    %156 = vector.broadcast %70 : vector<1x128xf32> to vector<16x128xf32>
    %157 = arith.mulf %86, %156 : vector<16x128xf32>
    %cst_53 = arith.constant dense<0.000000e+00> : vector<16x128xf32>
    %158 = tpu.matmul %155, %157, %cst_53 {dimension_numbers = #tpu.dot_dimension_numbers<[1], [0], [0], [1], [0, 0, 1, 1], [], []>} : vector<16x16xf32>, vector<16x128xf32>, vector<16x128xf32> -> vector<16x128xf32>
    %159 = arith.addf %141, %158 : vector<16x128xf32>
    %160 = vector.broadcast %49 : vector<1x128xf32> to vector<16x128xf32>
    %161 = arith.mulf %86, %160 : vector<16x128xf32>
    "tpu.trace_start"() <{level = 10 : i32, message = "nf,mf->nm"}> : () -> ()
    %cst_54 = arith.constant dense<0.000000e+00> : vector<16x16xf32>
    %162 = tpu.matmul %161, %87, %cst_54 {dimension_numbers = #tpu.dot_dimension_numbers<[1], [1], [0], [0], [0, 0, 1, 0], [], []>} : vector<16x128xf32>, vector<16x128xf32>, vector<16x16xf32> -> vector<16x16xf32>
    "tpu.trace_stop"() : () -> ()
    %cst_55 = arith.constant 0.353553385 : f32
    %163 = vector.broadcast %cst_55 : f32 to vector<16x16xf32>
    %164 = arith.mulf %162, %163 : vector<16x16xf32>
    %cst_56 = arith.constant dense<0xFF800000> : vector<16xf32>
    %165 = vector.multi_reduction <maximumf>, %164, %cst_56 [1] : vector<16x16xf32> to vector<16xf32>
    %166 = vector.shape_cast %165 : vector<16xf32> to vector<16x1xf32>
    %167 = vector.broadcast %166 : vector<16x1xf32> to vector<16x16xf32>
    %168 = arith.subf %164, %167 : vector<16x16xf32>
    %169 = math.exp %168 : vector<16x16xf32>
    %cst_57 = arith.constant dense<0.000000e+00> : vector<16xf32>
    %170 = vector.multi_reduction <add>, %169, %cst_57 [1] : vector<16x16xf32> to vector<16xf32>
    %171 = vector.shape_cast %170 : vector<16xf32> to vector<16x1xf32>
    %172 = vector.broadcast %171 : vector<16x1xf32> to vector<16x16xf32>
    %173 = arith.divf %169, %172 : vector<16x16xf32>
    %174 = vector.broadcast %77 : vector<1x128xf32> to vector<16x128xf32>
    %175 = arith.mulf %86, %174 : vector<16x128xf32>
    %cst_58 = arith.constant dense<0.000000e+00> : vector<16x128xf32>
    %176 = tpu.matmul %173, %175, %cst_58 {dimension_numbers = #tpu.dot_dimension_numbers<[1], [0], [0], [1], [0, 0, 1, 1], [], []>} : vector<16x16xf32>, vector<16x128xf32>, vector<16x128xf32> -> vector<16x128xf32>
    %177 = arith.addf %159, %176 : vector<16x128xf32>
    %178 = arith.truncf %177 : vector<16x128xf32> to vector<16x128xbf16>
    %c0_59 = arith.constant 0 : index
    %c0_60 = arith.constant 0 : index
    %c0_61 = arith.constant 0 : index
    %179 = vector.load %arg9[%c0_59, %c0_60, %c0_61] : memref<2x128x128xbf16, #tpu.memory_space<vmem>>, vector<1x128x128xbf16>
    %180 = vector.shape_cast %179 : vector<1x128x128xbf16> to vector<128x128xbf16>
    %cst_62 = arith.constant dense<0.000000e+00> : vector<16x128xf32>
    %181 = tpu.matmul %178, %180, %cst_62 {dimension_numbers = #tpu.dot_dimension_numbers<[1], [0], [0], [1], [0, 0, 1, 1], [], []>} : vector<16x128xbf16>, vector<128x128xbf16>, vector<16x128xf32> -> vector<16x128xf32>
    %c0_63 = arith.constant 0 : index
    %c0_64 = arith.constant 0 : index
    %c0_65 = arith.constant 0 : index
    %182 = vector.load %arg10[%c0_63, %c0_64, %c0_65] : memref<2x1x128xf32, #tpu.memory_space<vmem>>, vector<1x1x128xf32>
    %183 = vector.shape_cast %182 : vector<1x1x128xf32> to vector<1x128xf32>
    %184 = vector.broadcast %183 : vector<1x128xf32> to vector<16x128xf32>
    %185 = arith.addf %181, %184 : vector<16x128xf32>
    %186 = arith.addf %14, %185 : vector<16x128xf32>
    %c0_66 = arith.constant 0 : index
    %c0_67 = arith.constant 0 : index
    %c0_68 = arith.constant 0 : index
    %187 = vector.load %arg13[%c0_66, %c0_67, %c0_68] : memref<2x1x128xf32, #tpu.memory_space<vmem>>, vector<1x1x128xf32>
    %188 = vector.shape_cast %187 : vector<1x1x128xf32> to vector<1x128xf32>
    %189 = vector.broadcast %188 : vector<1x128xf32> to vector<16x128xf32>
    %190 = arith.mulf %186, %189 : vector<16x128xf32>
    %c0_69 = arith.constant 0 : index
    %c0_70 = arith.constant 0 : index
    %c0_71 = arith.constant 0 : index
    %191 = vector.load %arg14[%c0_69, %c0_70, %c0_71] : memref<2x1x128xf32, #tpu.memory_space<vmem>>, vector<1x1x128xf32>
    %192 = vector.shape_cast %191 : vector<1x1x128xf32> to vector<1x128xf32>
    %193 = vector.broadcast %192 : vector<1x128xf32> to vector<16x128xf32>
    %194 = arith.addf %190, %193 : vector<16x128xf32>
    %195 = arith.addf %104, %194 : vector<16x128xf32>
    %196 = arith.truncf %195 : vector<16x128xf32> to vector<16x128xbf16>
    %c0_72 = arith.constant 0 : index
    %c0_73 = arith.constant 0 : index
    %c0_74 = arith.constant 0 : index
    %197 = vector.load %arg15[%c0_72, %c0_73, %c0_74] : memref<2x128x128xbf16, #tpu.memory_space<vmem>>, vector<1x128x128xbf16>
    %198 = vector.shape_cast %197 : vector<1x128x128xbf16> to vector<128x128xbf16>
    %cst_75 = arith.constant dense<0.000000e+00> : vector<16x128xf32>
    %199 = tpu.matmul %196, %198, %cst_75 {dimension_numbers = #tpu.dot_dimension_numbers<[1], [0], [0], [1], [0, 0, 1, 1], [], []>} : vector<16x128xbf16>, vector<128x128xbf16>, vector<16x128xf32> -> vector<16x128xf32>
    %c0_76 = arith.constant 0 : index
    %c0_77 = arith.constant 0 : index
    %c0_78 = arith.constant 0 : index
    %200 = vector.load %arg16[%c0_76, %c0_77, %c0_78] : memref<2x1x128xf32, #tpu.memory_space<vmem>>, vector<1x1x128xf32>
    %201 = vector.shape_cast %200 : vector<1x1x128xf32> to vector<1x128xf32>
    %202 = vector.broadcast %201 : vector<1x128xf32> to vector<16x128xf32>
    %203 = arith.addf %199, %202 : vector<16x128xf32>
    %cst_79 = arith.constant 0.000000e+00 : f32
    %204 = vector.broadcast %cst_79 : f32 to vector<16x128xf32>
    %205 = arith.maximumf %203, %204 : vector<16x128xf32>
    %206 = arith.truncf %205 : vector<16x128xf32> to vector<16x128xbf16>
    %c0_80 = arith.constant 0 : index
    %c0_81 = arith.constant 0 : index
    %c0_82 = arith.constant 0 : index
    %207 = vector.load %arg17[%c0_80, %c0_81, %c0_82] : memref<2x128x128xbf16, #tpu.memory_space<vmem>>, vector<1x128x128xbf16>
    %208 = vector.shape_cast %207 : vector<1x128x128xbf16> to vector<128x128xbf16>
    %cst_83 = arith.constant dense<0.000000e+00> : vector<16x128xf32>
    %209 = tpu.matmul %206, %208, %cst_83 {dimension_numbers = #tpu.dot_dimension_numbers<[1], [0], [0], [1], [0, 0, 1, 1], [], []>} : vector<16x128xbf16>, vector<128x128xbf16>, vector<16x128xf32> -> vector<16x128xf32>
    %c0_84 = arith.constant 0 : index
    %c0_85 = arith.constant 0 : index
    %c0_86 = arith.constant 0 : index
    %210 = vector.load %arg18[%c0_84, %c0_85, %c0_86] : memref<2x1x128xf32, #tpu.memory_space<vmem>>, vector<1x1x128xf32>
    %211 = vector.shape_cast %210 : vector<1x1x128xf32> to vector<1x128xf32>
    %212 = vector.broadcast %211 : vector<1x128xf32> to vector<16x128xf32>
    %213 = arith.addf %209, %212 : vector<16x128xf32>
    %214 = arith.addf %195, %213 : vector<16x128xf32>
    %c0_87 = arith.constant 0 : index
    %c0_88 = arith.constant 0 : index
    %c0_89 = arith.constant 0 : index
    %215 = vector.load %arg19[%c0_87, %c0_88, %c0_89] : memref<2x1x128xf32, #tpu.memory_space<vmem>>, vector<1x1x128xf32>
    %216 = vector.shape_cast %215 : vector<1x1x128xf32> to vector<1x128xf32>
    %217 = vector.broadcast %216 : vector<1x128xf32> to vector<16x128xf32>
    %218 = arith.mulf %214, %217 : vector<16x128xf32>
    %c0_90 = arith.constant 0 : index
    %c0_91 = arith.constant 0 : index
    %c0_92 = arith.constant 0 : index
    %219 = vector.load %arg20[%c0_90, %c0_91, %c0_92] : memref<2x1x128xf32, #tpu.memory_space<vmem>>, vector<1x1x128xf32>
    %220 = vector.shape_cast %219 : vector<1x1x128xf32> to vector<1x128xf32>
    %221 = vector.broadcast %220 : vector<1x128xf32> to vector<16x128xf32>
    %222 = arith.addf %218, %221 : vector<16x128xf32>
    %223 = arith.truncf %222 : vector<16x128xf32> to vector<16x128xbf16>
    %c1 = arith.constant 1 : index
    %c0_93 = arith.constant 0 : index
    %c0_94 = arith.constant 0 : index
    %224 = vector.load %arg6[%c1, %c0_93, %c0_94] : memref<2x128x256xbf16, #tpu.memory_space<vmem>>, vector<1x128x256xbf16>
    %225 = vector.shape_cast %224 : vector<1x128x256xbf16> to vector<128x256xbf16>
    %cst_95 = arith.constant dense<0.000000e+00> : vector<16x256xf32>
    %226 = tpu.matmul %223, %225, %cst_95 {dimension_numbers = #tpu.dot_dimension_numbers<[1], [0], [0], [1], [0, 0, 1, 1], [], []>} : vector<16x128xbf16>, vector<128x256xbf16>, vector<16x256xf32> -> vector<16x256xf32>
    %c1_96 = arith.constant 1 : index
    %c0_97 = arith.constant 0 : index
    %c0_98 = arith.constant 0 : index
    %227 = vector.load %arg7[%c1_96, %c0_97, %c0_98] : memref<2x1x256xf32, #tpu.memory_space<vmem>>, vector<1x1x256xf32>
    %228 = vector.shape_cast %227 : vector<1x1x256xf32> to vector<1x256xf32>
    %229 = vector.broadcast %228 : vector<1x256xf32> to vector<16x256xf32>
    %230 = arith.addf %226, %229 : vector<16x256xf32>
    %231 = vector.extract_strided_slice %230 {offsets = [0, 0], sizes = [16, 128], strides = [1, 1]} : vector<16x256xf32> to vector<16x128xf32>
    %232 = vector.extract_strided_slice %230 {offsets = [0, 128], sizes = [16, 128], strides = [1, 1]} : vector<16x256xf32> to vector<16x128xf32>
    %233 = vector.broadcast %21 : vector<1x128xf32> to vector<16x128xf32>
    %234 = arith.mulf %231, %233 : vector<16x128xf32>
    %235 = arith.truncf %234 : vector<16x128xf32> to vector<16x128xbf16>
    %cst_99 = arith.constant dense<0.000000e+00> : vector<16x128xf32>
    %236 = tpu.matmul %16, %235, %cst_99 {dimension_numbers = #tpu.dot_dimension_numbers<[1], [0], [0], [1], [0, 0, 1, 1], [], []>} : vector<16x16xbf16>, vector<16x128xbf16>, vector<16x128xf32> -> vector<16x128xf32>
    %c1_100 = arith.constant 1 : index
    %c0_101 = arith.constant 0 : index
    %c0_102 = arith.constant 0 : index
    %237 = vector.load %arg8[%c1_100, %c0_101, %c0_102] : memref<2x1x128xf32, #tpu.memory_space<vmem>>, vector<1x1x128xf32>
    %238 = vector.shape_cast %237 : vector<1x1x128xf32> to vector<1x128xf32>
    %239 = vector.broadcast %238 : vector<1x128xf32> to vector<16x128xf32>
    %240 = arith.addf %236, %239 : vector<16x128xf32>
    %241 = arith.addf %222, %240 : vector<16x128xf32>
    %c1_103 = arith.constant 1 : index
    %c0_104 = arith.constant 0 : index
    %c0_105 = arith.constant 0 : index
    %242 = vector.load %arg11[%c1_103, %c0_104, %c0_105] : memref<2x1x128xf32, #tpu.memory_space<vmem>>, vector<1x1x128xf32>
    %243 = vector.shape_cast %242 : vector<1x1x128xf32> to vector<1x128xf32>
    %244 = vector.broadcast %243 : vector<1x128xf32> to vector<16x128xf32>
    %245 = arith.mulf %241, %244 : vector<16x128xf32>
    %c1_106 = arith.constant 1 : index
    %c0_107 = arith.constant 0 : index
    %c0_108 = arith.constant 0 : index
    %246 = vector.load %arg12[%c1_106, %c0_107, %c0_108] : memref<2x1x128xf32, #tpu.memory_space<vmem>>, vector<1x1x128xf32>
    %247 = vector.shape_cast %246 : vector<1x1x128xf32> to vector<1x128xf32>
    %248 = vector.broadcast %247 : vector<1x128xf32> to vector<16x128xf32>
    %249 = arith.addf %245, %248 : vector<16x128xf32>
    %cst_109 = arith.constant 0.000000e+00 : f32
    %250 = vector.broadcast %cst_109 : f32 to vector<16x128xf32>
    %251 = vector.broadcast %28 : vector<1x128xf32> to vector<16x128xf32>
    %252 = arith.mulf %231, %251 : vector<16x128xf32>
    "tpu.trace_start"() <{level = 10 : i32, message = "nf,mf->nm"}> : () -> ()
    %cst_110 = arith.constant dense<0.000000e+00> : vector<16x16xf32>
    %253 = tpu.matmul %252, %232, %cst_110 {dimension_numbers = #tpu.dot_dimension_numbers<[1], [1], [0], [0], [0, 0, 1, 0], [], []>} : vector<16x128xf32>, vector<16x128xf32>, vector<16x16xf32> -> vector<16x16xf32>
    "tpu.trace_stop"() : () -> ()
    %cst_111 = arith.constant 0.353553385 : f32
    %254 = vector.broadcast %cst_111 : f32 to vector<16x16xf32>
    %255 = arith.mulf %253, %254 : vector<16x16xf32>
    %cst_112 = arith.constant dense<0xFF800000> : vector<16xf32>
    %256 = vector.multi_reduction <maximumf>, %255, %cst_112 [1] : vector<16x16xf32> to vector<16xf32>
    %257 = vector.shape_cast %256 : vector<16xf32> to vector<16x1xf32>
    %258 = vector.broadcast %257 : vector<16x1xf32> to vector<16x16xf32>
    %259 = arith.subf %255, %258 : vector<16x16xf32>
    %260 = math.exp %259 : vector<16x16xf32>
    %cst_113 = arith.constant dense<0.000000e+00> : vector<16xf32>
    %261 = vector.multi_reduction <add>, %260, %cst_113 [1] : vector<16x16xf32> to vector<16xf32>
    %262 = vector.shape_cast %261 : vector<16xf32> to vector<16x1xf32>
    %263 = vector.broadcast %262 : vector<16x1xf32> to vector<16x16xf32>
    %264 = arith.divf %260, %263 : vector<16x16xf32>
    %265 = vector.broadcast %56 : vector<1x128xf32> to vector<16x128xf32>
    %266 = arith.mulf %231, %265 : vector<16x128xf32>
    %cst_114 = arith.constant dense<0.000000e+00> : vector<16x128xf32>
    %267 = tpu.matmul %264, %266, %cst_114 {dimension_numbers = #tpu.dot_dimension_numbers<[1], [0], [0], [1], [0, 0, 1, 1], [], []>} : vector<16x16xf32>, vector<16x128xf32>, vector<16x128xf32> -> vector<16x128xf32>
    %268 = arith.addf %250, %267 : vector<16x128xf32>
    %269 = vector.broadcast %35 : vector<1x128xf32> to vector<16x128xf32>
    %270 = arith.mulf %231, %269 : vector<16x128xf32>
    "tpu.trace_start"() <{level = 10 : i32, message = "nf,mf->nm"}> : () -> ()
    %cst_115 = arith.constant dense<0.000000e+00> : vector<16x16xf32>
    %271 = tpu.matmul %270, %232, %cst_115 {dimension_numbers = #tpu.dot_dimension_numbers<[1], [1], [0], [0], [0, 0, 1, 0], [], []>} : vector<16x128xf32>, vector<16x128xf32>, vector<16x16xf32> -> vector<16x16xf32>
    "tpu.trace_stop"() : () -> ()
    %cst_116 = arith.constant 0.353553385 : f32
    %272 = vector.broadcast %cst_116 : f32 to vector<16x16xf32>
    %273 = arith.mulf %271, %272 : vector<16x16xf32>
    %cst_117 = arith.constant dense<0xFF800000> : vector<16xf32>
    %274 = vector.multi_reduction <maximumf>, %273, %cst_117 [1] : vector<16x16xf32> to vector<16xf32>
    %275 = vector.shape_cast %274 : vector<16xf32> to vector<16x1xf32>
    %276 = vector.broadcast %275 : vector<16x1xf32> to vector<16x16xf32>
    %277 = arith.subf %273, %276 : vector<16x16xf32>
    %278 = math.exp %277 : vector<16x16xf32>
    %cst_118 = arith.constant dense<0.000000e+00> : vector<16xf32>
    %279 = vector.multi_reduction <add>, %278, %cst_118 [1] : vector<16x16xf32> to vector<16xf32>
    %280 = vector.shape_cast %279 : vector<16xf32> to vector<16x1xf32>
    %281 = vector.broadcast %280 : vector<16x1xf32> to vector<16x16xf32>
    %282 = arith.divf %278, %281 : vector<16x16xf32>
    %283 = vector.broadcast %63 : vector<1x128xf32> to vector<16x128xf32>
    %284 = arith.mulf %231, %283 : vector<16x128xf32>
    %cst_119 = arith.constant dense<0.000000e+00> : vector<16x128xf32>
    %285 = tpu.matmul %282, %284, %cst_119 {dimension_numbers = #tpu.dot_dimension_numbers<[1], [0], [0], [1], [0, 0, 1, 1], [], []>} : vector<16x16xf32>, vector<16x128xf32>, vector<16x128xf32> -> vector<16x128xf32>
    %286 = arith.addf %268, %285 : vector<16x128xf32>
    %287 = vector.broadcast %42 : vector<1x128xf32> to vector<16x128xf32>
    %288 = arith.mulf %231, %287 : vector<16x128xf32>
    "tpu.trace_start"() <{level = 10 : i32, message = "nf,mf->nm"}> : () -> ()
    %cst_120 = arith.constant dense<0.000000e+00> : vector<16x16xf32>
    %289 = tpu.matmul %288, %232, %cst_120 {dimension_numbers = #tpu.dot_dimension_numbers<[1], [1], [0], [0], [0, 0, 1, 0], [], []>} : vector<16x128xf32>, vector<16x128xf32>, vector<16x16xf32> -> vector<16x16xf32>
    "tpu.trace_stop"() : () -> ()
    %cst_121 = arith.constant 0.353553385 : f32
    %290 = vector.broadcast %cst_121 : f32 to vector<16x16xf32>
    %291 = arith.mulf %289, %290 : vector<16x16xf32>
    %cst_122 = arith.constant dense<0xFF800000> : vector<16xf32>
    %292 = vector.multi_reduction <maximumf>, %291, %cst_122 [1] : vector<16x16xf32> to vector<16xf32>
    %293 = vector.shape_cast %292 : vector<16xf32> to vector<16x1xf32>
    %294 = vector.broadcast %293 : vector<16x1xf32> to vector<16x16xf32>
    %295 = arith.subf %291, %294 : vector<16x16xf32>
    %296 = math.exp %295 : vector<16x16xf32>
    %cst_123 = arith.constant dense<0.000000e+00> : vector<16xf32>
    %297 = vector.multi_reduction <add>, %296, %cst_123 [1] : vector<16x16xf32> to vector<16xf32>
    %298 = vector.shape_cast %297 : vector<16xf32> to vector<16x1xf32>
    %299 = vector.broadcast %298 : vector<16x1xf32> to vector<16x16xf32>
    %300 = arith.divf %296, %299 : vector<16x16xf32>
    %301 = vector.broadcast %70 : vector<1x128xf32> to vector<16x128xf32>
    %302 = arith.mulf %231, %301 : vector<16x128xf32>
    %cst_124 = arith.constant dense<0.000000e+00> : vector<16x128xf32>
    %303 = tpu.matmul %300, %302, %cst_124 {dimension_numbers = #tpu.dot_dimension_numbers<[1], [0], [0], [1], [0, 0, 1, 1], [], []>} : vector<16x16xf32>, vector<16x128xf32>, vector<16x128xf32> -> vector<16x128xf32>
    %304 = arith.addf %286, %303 : vector<16x128xf32>
    %305 = vector.broadcast %49 : vector<1x128xf32> to vector<16x128xf32>
    %306 = arith.mulf %231, %305 : vector<16x128xf32>
    "tpu.trace_start"() <{level = 10 : i32, message = "nf,mf->nm"}> : () -> ()
    %cst_125 = arith.constant dense<0.000000e+00> : vector<16x16xf32>
    %307 = tpu.matmul %306, %232, %cst_125 {dimension_numbers = #tpu.dot_dimension_numbers<[1], [1], [0], [0], [0, 0, 1, 0], [], []>} : vector<16x128xf32>, vector<16x128xf32>, vector<16x16xf32> -> vector<16x16xf32>
    "tpu.trace_stop"() : () -> ()
    %cst_126 = arith.constant 0.353553385 : f32
    %308 = vector.broadcast %cst_126 : f32 to vector<16x16xf32>
    %309 = arith.mulf %307, %308 : vector<16x16xf32>
    %cst_127 = arith.constant dense<0xFF800000> : vector<16xf32>
    %310 = vector.multi_reduction <maximumf>, %309, %cst_127 [1] : vector<16x16xf32> to vector<16xf32>
    %311 = vector.shape_cast %310 : vector<16xf32> to vector<16x1xf32>
    %312 = vector.broadcast %311 : vector<16x1xf32> to vector<16x16xf32>
    %313 = arith.subf %309, %312 : vector<16x16xf32>
    %314 = math.exp %313 : vector<16x16xf32>
    %cst_128 = arith.constant dense<0.000000e+00> : vector<16xf32>
    %315 = vector.multi_reduction <add>, %314, %cst_128 [1] : vector<16x16xf32> to vector<16xf32>
    %316 = vector.shape_cast %315 : vector<16xf32> to vector<16x1xf32>
    %317 = vector.broadcast %316 : vector<16x1xf32> to vector<16x16xf32>
    %318 = arith.divf %314, %317 : vector<16x16xf32>
    %319 = vector.broadcast %77 : vector<1x128xf32> to vector<16x128xf32>
    %320 = arith.mulf %231, %319 : vector<16x128xf32>
    %cst_129 = arith.constant dense<0.000000e+00> : vector<16x128xf32>
    %321 = tpu.matmul %318, %320, %cst_129 {dimension_numbers = #tpu.dot_dimension_numbers<[1], [0], [0], [1], [0, 0, 1, 1], [], []>} : vector<16x16xf32>, vector<16x128xf32>, vector<16x128xf32> -> vector<16x128xf32>
    %322 = arith.addf %304, %321 : vector<16x128xf32>
    %323 = arith.truncf %322 : vector<16x128xf32> to vector<16x128xbf16>
    %c1_130 = arith.constant 1 : index
    %c0_131 = arith.constant 0 : index
    %c0_132 = arith.constant 0 : index
    %324 = vector.load %arg9[%c1_130, %c0_131, %c0_132] : memref<2x128x128xbf16, #tpu.memory_space<vmem>>, vector<1x128x128xbf16>
    %325 = vector.shape_cast %324 : vector<1x128x128xbf16> to vector<128x128xbf16>
    %cst_133 = arith.constant dense<0.000000e+00> : vector<16x128xf32>
    %326 = tpu.matmul %323, %325, %cst_133 {dimension_numbers = #tpu.dot_dimension_numbers<[1], [0], [0], [1], [0, 0, 1, 1], [], []>} : vector<16x128xbf16>, vector<128x128xbf16>, vector<16x128xf32> -> vector<16x128xf32>
    %c1_134 = arith.constant 1 : index
    %c0_135 = arith.constant 0 : index
    %c0_136 = arith.constant 0 : index
    %327 = vector.load %arg10[%c1_134, %c0_135, %c0_136] : memref<2x1x128xf32, #tpu.memory_space<vmem>>, vector<1x1x128xf32>
    %328 = vector.shape_cast %327 : vector<1x1x128xf32> to vector<1x128xf32>
    %329 = vector.broadcast %328 : vector<1x128xf32> to vector<16x128xf32>
    %330 = arith.addf %326, %329 : vector<16x128xf32>
    %331 = arith.addf %222, %330 : vector<16x128xf32>
    %c1_137 = arith.constant 1 : index
    %c0_138 = arith.constant 0 : index
    %c0_139 = arith.constant 0 : index
    %332 = vector.load %arg13[%c1_137, %c0_138, %c0_139] : memref<2x1x128xf32, #tpu.memory_space<vmem>>, vector<1x1x128xf32>
    %333 = vector.shape_cast %332 : vector<1x1x128xf32> to vector<1x128xf32>
    %334 = vector.broadcast %333 : vector<1x128xf32> to vector<16x128xf32>
    %335 = arith.mulf %331, %334 : vector<16x128xf32>
    %c1_140 = arith.constant 1 : index
    %c0_141 = arith.constant 0 : index
    %c0_142 = arith.constant 0 : index
    %336 = vector.load %arg14[%c1_140, %c0_141, %c0_142] : memref<2x1x128xf32, #tpu.memory_space<vmem>>, vector<1x1x128xf32>
    %337 = vector.shape_cast %336 : vector<1x1x128xf32> to vector<1x128xf32>
    %338 = vector.broadcast %337 : vector<1x128xf32> to vector<16x128xf32>
    %339 = arith.addf %335, %338 : vector<16x128xf32>
    %340 = arith.addf %249, %339 : vector<16x128xf32>
    %341 = arith.truncf %340 : vector<16x128xf32> to vector<16x128xbf16>
    %c1_143 = arith.constant 1 : index
    %c0_144 = arith.constant 0 : index
    %c0_145 = arith.constant 0 : index
    %342 = vector.load %arg15[%c1_143, %c0_144, %c0_145] : memref<2x128x128xbf16, #tpu.memory_space<vmem>>, vector<1x128x128xbf16>
    %343 = vector.shape_cast %342 : vector<1x128x128xbf16> to vector<128x128xbf16>
    %cst_146 = arith.constant dense<0.000000e+00> : vector<16x128xf32>
    %344 = tpu.matmul %341, %343, %cst_146 {dimension_numbers = #tpu.dot_dimension_numbers<[1], [0], [0], [1], [0, 0, 1, 1], [], []>} : vector<16x128xbf16>, vector<128x128xbf16>, vector<16x128xf32> -> vector<16x128xf32>
    %c1_147 = arith.constant 1 : index
    %c0_148 = arith.constant 0 : index
    %c0_149 = arith.constant 0 : index
    %345 = vector.load %arg16[%c1_147, %c0_148, %c0_149] : memref<2x1x128xf32, #tpu.memory_space<vmem>>, vector<1x1x128xf32>
    %346 = vector.shape_cast %345 : vector<1x1x128xf32> to vector<1x128xf32>
    %347 = vector.broadcast %346 : vector<1x128xf32> to vector<16x128xf32>
    %348 = arith.addf %344, %347 : vector<16x128xf32>
    %cst_150 = arith.constant 0.000000e+00 : f32
    %349 = vector.broadcast %cst_150 : f32 to vector<16x128xf32>
    %350 = arith.maximumf %348, %349 : vector<16x128xf32>
    %351 = arith.truncf %350 : vector<16x128xf32> to vector<16x128xbf16>
    %c1_151 = arith.constant 1 : index
    %c0_152 = arith.constant 0 : index
    %c0_153 = arith.constant 0 : index
    %352 = vector.load %arg17[%c1_151, %c0_152, %c0_153] : memref<2x128x128xbf16, #tpu.memory_space<vmem>>, vector<1x128x128xbf16>
    %353 = vector.shape_cast %352 : vector<1x128x128xbf16> to vector<128x128xbf16>
    %cst_154 = arith.constant dense<0.000000e+00> : vector<16x128xf32>
    %354 = tpu.matmul %351, %353, %cst_154 {dimension_numbers = #tpu.dot_dimension_numbers<[1], [0], [0], [1], [0, 0, 1, 1], [], []>} : vector<16x128xbf16>, vector<128x128xbf16>, vector<16x128xf32> -> vector<16x128xf32>
    %c1_155 = arith.constant 1 : index
    %c0_156 = arith.constant 0 : index
    %c0_157 = arith.constant 0 : index
    %355 = vector.load %arg18[%c1_155, %c0_156, %c0_157] : memref<2x1x128xf32, #tpu.memory_space<vmem>>, vector<1x1x128xf32>
    %356 = vector.shape_cast %355 : vector<1x1x128xf32> to vector<1x128xf32>
    %357 = vector.broadcast %356 : vector<1x128xf32> to vector<16x128xf32>
    %358 = arith.addf %354, %357 : vector<16x128xf32>
    %359 = arith.addf %340, %358 : vector<16x128xf32>
    %c1_158 = arith.constant 1 : index
    %c0_159 = arith.constant 0 : index
    %c0_160 = arith.constant 0 : index
    %360 = vector.load %arg19[%c1_158, %c0_159, %c0_160] : memref<2x1x128xf32, #tpu.memory_space<vmem>>, vector<1x1x128xf32>
    %361 = vector.shape_cast %360 : vector<1x1x128xf32> to vector<1x128xf32>
    %362 = vector.broadcast %361 : vector<1x128xf32> to vector<16x128xf32>
    %363 = arith.mulf %359, %362 : vector<16x128xf32>
    %c1_161 = arith.constant 1 : index
    %c0_162 = arith.constant 0 : index
    %c0_163 = arith.constant 0 : index
    %364 = vector.load %arg20[%c1_161, %c0_162, %c0_163] : memref<2x1x128xf32, #tpu.memory_space<vmem>>, vector<1x1x128xf32>
    %365 = vector.shape_cast %364 : vector<1x1x128xf32> to vector<1x128xf32>
    %366 = vector.broadcast %365 : vector<1x128xf32> to vector<16x128xf32>
    %367 = arith.addf %363, %366 : vector<16x128xf32>
    %cst_164 = arith.constant dense<0.000000e+00> : vector<128xf32>
    %368 = vector.multi_reduction <add>, %367, %cst_164 [0] : vector<16x128xf32> to vector<128xf32>
    %369 = vector.shape_cast %368 : vector<128xf32> to vector<1x128xf32>
    %cst_165 = arith.constant 1.600000e+01 : f32
    %370 = vector.broadcast %cst_165 : f32 to vector<1x128xf32>
    %371 = arith.divf %369, %370 : vector<1x128xf32>
    %372 = arith.truncf %371 : vector<1x128xf32> to vector<1x128xbf16>
    %c0_166 = arith.constant 0 : index
    %c0_167 = arith.constant 0 : index
    %373 = vector.load %arg21[%c0_166, %c0_167] : memref<128x128xbf16, #tpu.memory_space<vmem>>, vector<128x128xbf16>
    %cst_168 = arith.constant dense<0.000000e+00> : vector<1x128xf32>
    %374 = tpu.matmul %372, %373, %cst_168 {dimension_numbers = #tpu.dot_dimension_numbers<[1], [0], [0], [1], [0, 0, 1, 1], [], []>} : vector<1x128xbf16>, vector<128x128xbf16>, vector<1x128xf32> -> vector<1x128xf32>
    %c0_169 = arith.constant 0 : index
    %c0_170 = arith.constant 0 : index
    %375 = vector.load %arg22[%c0_169, %c0_170] : memref<1x128xf32, #tpu.memory_space<vmem>>, vector<1x128xf32>
    %376 = arith.addf %374, %375 : vector<1x128xf32>
    %c0_171 = arith.constant 0 : index
    %c0_172 = arith.constant 0 : index
    %377 = vector.load %arg23[%c0_171, %c0_172] : memref<1x128xf32, #tpu.memory_space<vmem>>, vector<1x128xf32>
    tpu.vector_store %arg23[%c0_171, %c0_172], %376 {strides = array<i32>} : memref<1x128xf32, #tpu.memory_space<vmem>>, vector<1x128xf32>,
    return
  }
}

</mosaic_0001>

<bundles_post_ra>
// kernel: tpu_custom_call.1
= control target key start
LH: loop header
LB: loop body
LE: loop exit
PB: predicated region body
PF: predicated region fallthrough
CT: control target
= control target key end

     0   :  { %s5449_s0 = inlined_call_operand.hbm [shape: f32[16,128], index: 0, kind: input, shape index: {}]   ;;  %s5450_s1 = inlined_call_operand.hbm [shape: f32[16,16], index: 1, kind: input, shape index: {}]   ;;  %s5451_s2 = inlined_call_operand.hbm [shape: bf16[128,128], index: 2, kind: input, shape index: {}]   ;;  %s5452_s3 = inlined_call_operand.vmem [shape: f32[1,128], index: 3, kind: input, shape index: {}]   ;;  %s5453_s4 = inlined_call_operand.hbm [shape: bf16[128,128], index: 4, kind: input, shape index: {}]   ;;  %s5454_s5 = inlined_call_operand.hbm [shape: f32[1,128], index: 5, kind: input, shape index: {}]   ;;  %s5455_s6 = inlined_call_operand.hbm [shape: bf16[2,128,256], index: 6, kind: input, shape index: {}]   ;;  %s5456_s7 = inlined_call_operand.vmem [shape: f32[2,1,256], index: 7, kind: input, shape index: {}]   ;;  %s5457_s8 = inlined_call_operand.vmem [shape: f32[2,1,128], index: 8, kind: input, shape index: {}]   ;;  %s5458_s9 = inlined_call_operand.hbm [shape: bf16[2,128,128], index: 9, kind: input, shape index: {}]   ;;  %s5459_s10 = inlined_call_operand.vmem [shape: f32[2,1,128], index: 10, kind: input, shape index: {}]   ;;  %s5460_s11 = inlined_call_operand.vmem [shape: f32[2,1,128], index: 11, kind: input, shape index: {}]   ;;  %s5461_s12 = inlined_call_operand.vmem [shape: f32[2,1,128], index: 12, kind: input, shape index: {}]   ;;  %s5462_s13 = inlined_call_operand.vmem [shape: f32[2,1,128], index: 13, kind: input, shape index: {}]   ;;  %s5463_s14 = inlined_call_operand.hbm [shape: f32[2,1,128], index: 14, kind: input, shape index: {}]   ;;  %s5464_s15 = inlined_call_operand.hbm [shape: bf16[2,128,128], index: 15, kind: input, shape index: {}]   ;;  %s5465_s16 = inlined_call_operand.hbm [shape: f32[2,1,128], index: 16, kind: input, shape index: {}]   ;;  %s5466_s17 = inlined_call_operand.hbm [shape: bf16[2,128,128], index: 17, kind: input, shape index: {}]   ;;  %s5467_s18 = inlined_call_operand.hbm [shape: f32[2,1,128], index: 18, kind: input, shape index: {}]   ;;  %s5468_s19 = inlined_call_operand.hbm [shape: f32[2,1,128], index: 19, kind: input, shape index: {}]   ;;  %s5469_s20 = inlined_call_operand.hbm [shape: f32[2,1,128], index: 20, kind: input, shape index: {}]   ;;  %s5470_s21 = inlined_call_operand.vmem [shape: bf16[128,128], index: 21, kind: input, shape index: {}]   ;;  %s5471_s22 = inlined_call_operand.vmem [shape: f32[1,128], index: 22, kind: input, shape index: {}]   ;;  %s5472_s23 = inlined_call_operand.hbm [shape: f32[1,128], index: 23, kind: output, shape index: {}]  }
   0x1   :  { %5486 = sst [smem:[#allocation35_spill]] %s5449_s0 }
   0x2   :  { %5487 = sst [smem:[#allocation36_spill]] %s5450_s1 }
   0x3   :  { %5488 = sst [smem:[#allocation37_spill]] %s5451_s2 }
   0x4   :  { %5489 = sst [smem:[#allocation38_spill]] %s5452_s3 }
   0x5   :  { %5490 = sst [smem:[#allocation39_spill]] %s5453_s4 }
   0x6   :  { %5491 = sst [smem:[#allocation40_spill]] %s5454_s5 }
   0x7   :  { %5492 = sst [smem:[#allocation41_spill]] %s5455_s6 }
   0x8   :  { %5493 = sst [smem:[#allocation42_spill]] %s5456_s7 }
   0x9   :  { %5494 = sst [smem:[#allocation43_spill]] %s5470_s21 }
   0xa   :  { %5495 = sst [smem:[#allocation44_spill]] %s5471_s22 }
   0xb   :  { %5496 = sst [smem:[#allocation45_spill]] %s5472_s23 }
   0xc   :  { %28 = vsyncpa [#allocation3], 0 }
   0xd   :  { %29 = vsyncpa [#allocation6], 0 }
   0xe   :  { %30 = vsyncpa [#allocation9], 0 }
   0xf   :  { %31 = vsyncpa [#allocation12], 0 }
  0x10   :  { %32 = vsyncpa [#allocation15], 0 }
  0x11   :  { %33 = vsyncpa [#allocation18], 0 }
  0x12   :  { %34 = vsyncpa [#allocation21], 0 }
  0x13   :  { %35 = vsyncpa [#allocation24], 0 }
  0x14   :  { %36 = vsyncpa [#allocation4], 0  ;;  %s4635_s4 = smov [#allocation5]   ;;  %s5497_s5 = sld [smem:[#allocation36_spill]] }
  0x15   :  { %s54_s30 = sshll.u32 %s4635_s4, 4  ;;  %s55_s30 = int_to_ptr.vmem [resolvable:$true] %s54_s30 }
  0x1a   :  { %s4287_s1 = scalar_lea.hbm %s5497_s5, 256 }
  0x1b   :  { %p4288_p0 = scmp.ne.s32.totalorder %s5497_s5, %s4287_s1  ;;  %p4291_p1 = scmp.lt.u32.totalorder %s4287_s1, %s5497_s5 }
  0x1d   :  { %p4293_p2 = pnand %p4291_p1, %p4288_p0 }
  0x1f   :  { %4296 = shalt.err (!%p4293_p2)
}
  0x20   :  { %s4297_s7 = scalar_lea.vmem %s55_s30, 256  ;;  %p4302_p4 = scmp.lt.s32.totalorder %s55_s30, %s55_s30 }
  0x21   :  { %p4298_p3 = scmp.ne.s32.totalorder %s55_s30, %s4297_s7  ;;  %p4303_p5 = scmp.lt.s32.totalorder %s4297_s7, %s4297_s7 }
  0x23   :  { %p4304_p6 = por %p4303_p5, %p4302_p4 }
  0x25   :  { %p4305_p7 = pnand %p4304_p6, %p4298_p3 }
  0x27   :  { %4308 = shalt.err (!%p4305_p7)
}
  0x28   :  { %s4636_s28 = smov 128   ;;  %s4637_s29 = smov 8  }
  0x29   :  { %60 = dma.hbm_to_vmem [thread:$0]  %s5497_s5, 256, %s55_s30, [#allocation6], %s4636_s28, %s4636_s28, %s4637_s29  }
  0x2a   :  { %s4638_s4 = smov [#allocation8]   ;;  %s4639_s25 = smov [#allocation11]  }
  0x2b   :  { %s80_s24 = sshll.u32 %s4638_s4, 4  ;;  %s102_s1 = sshll.u32 %s4639_s25, 4  ;;  %s81_s24 = int_to_ptr.vmem [resolvable:$true] %s80_s24  ;;  %s103_s1 = int_to_ptr.vmem [resolvable:$true] %s102_s1 }
  0x2c   :  { %s5498_s6 = sld [smem:[#allocation39_spill]] }
  0x32   :  { %s4309_s27 = scalar_lea.hbm %s5498_s6, 1024 }
  0x33   :  { %p4310_p8 = scmp.ne.s32.totalorder %s5498_s6, %s4309_s27  ;;  %p4313_p9 = scmp.lt.u32.totalorder %s4309_s27, %s5498_s6 }
  0x35   :  { %p4315_p10 = pnand %p4313_p9, %p4310_p8 }
  0x37   :  { %4318 = shalt.err (!%p4315_p10)
}
  0x38   :  { %s4319_s30 = scalar_lea.vmem %s81_s24, 1024  ;;  %p4324_p12 = scmp.lt.s32.totalorder %s81_s24, %s81_s24 }
  0x39   :  { %p4320_p11 = scmp.ne.s32.totalorder %s81_s24, %s4319_s30  ;;  %p4325_p13 = scmp.lt.s32.totalorder %s4319_s30, %s4319_s30 }
  0x3b   :  { %p4326_p0 = por %p4325_p13, %p4324_p12 }
  0x3d   :  { %p4327_p1 = pnand %p4326_p0, %p4320_p11 }
  0x3f   :  { %4330 = shalt.err (!%p4327_p1)
}
  0x40   :  { %s5482_s5 = smov 64   ;;  %s5484_s3 = smov 4  }
  0x41   :  { %86 = dma.hbm_to_vmem [thread:$0]  %s5498_s6, 1024, %s81_s24, [#allocation9], %s5482_s5, %s5482_s5, %s5484_s3  }
  0x42   :  { %s5499_s4 = sld [smem:[#allocation41_spill]] }
  0x48   :  { %s4331_s25 = scalar_lea.hbm %s5499_s4, 4096 }
  0x49   :  { %p4332_p2 = scmp.ne.s32.totalorder %s5499_s4, %s4331_s25  ;;  %p4335_p3 = scmp.lt.u32.totalorder %s4331_s25, %s5499_s4 }
  0x4b   :  { %p4337_p4 = pnand %p4335_p3, %p4332_p2 }
  0x4d   :  { %4340 = shalt.err (!%p4337_p4)
}
  0x4e   :  { %s4341_s30 = scalar_lea.vmem %s103_s1, 4096  ;;  %p4346_p6 = scmp.lt.s32.totalorder %s103_s1, %s103_s1 }
  0x4f   :  { %p4342_p5 = scmp.ne.s32.totalorder %s103_s1, %s4341_s30  ;;  %p4347_p7 = scmp.lt.s32.totalorder %s4341_s30, %s4341_s30 }
  0x51   :  { %p4348_p8 = por %p4347_p7, %p4346_p6 }
  0x53   :  { %p4349_p9 = pnand %p4348_p8, %p4342_p5 }
  0x55   :  { %4352 = shalt.err (!%p4349_p9)
}
  0x56   :  { %108 = dma.hbm_to_vmem [thread:$0]  %s5499_s4, 4096, %s103_s1, [#allocation12], %s4636_s28, %s4636_s28, %s4637_s29  }
  0x57   :  { %s4642_s23 = smov [#allocation14]   ;;  %s4353_s25 = scalar_lea.hbm %s5463_s14, 32 }
  0x58   :  { %s138_s0 = sshll.u32 %s4642_s23, 4  ;;  %p4354_p10 = scmp.ne.s32.totalorder %s5463_s14, %s4353_s25  ;;  %s139_s0 = int_to_ptr.vmem [resolvable:$true] %s138_s0 }
  0x59   :  { %p4357_p11 = scmp.lt.u32.totalorder %s4353_s25, %s5463_s14 }
  0x5b   :  { %p4359_p12 = pnand %p4357_p11, %p4354_p10 }
  0x5d   :  { %4362 = shalt.err (!%p4359_p12)
}
  0x5e   :  { %s4363_s30 = scalar_lea.vmem %s139_s0, 32  ;;  %p4368_p0 = scmp.lt.s32.totalorder %s139_s0, %s139_s0 }
  0x5f   :  { %p4364_p13 = scmp.ne.s32.totalorder %s139_s0, %s4363_s30  ;;  %p4369_p1 = scmp.lt.s32.totalorder %s4363_s30, %s4363_s30 }
  0x61   :  { %p4370_p2 = por %p4369_p1, %p4368_p0 }
  0x63   :  { %p4371_p3 = pnand %p4370_p2, %p4364_p13 }
  0x65   :  { %4374 = shalt.err (!%p4371_p3)
}
  0x66   :  { %s4643_s1 = smov 16   ;;  %s4644_s4 = smov 1  }
  0x67   :  { %144 = dma.hbm_to_vmem [thread:$0]  %s5463_s14, 32, %s139_s0, [#allocation15], %s4643_s1, %s4643_s1, %s4644_s4  }
  0x68   :  { %s4645_s23 = smov [#allocation17]   ;;  %s4646_s22 = smov [#allocation20]  }
  0x69   :  { %s162_s21 = sshll.u32 %s4645_s23, 4  ;;  %s186_s25 = sshll.u32 %s4646_s22, 4  ;;  %s163_s21 = int_to_ptr.vmem [resolvable:$true] %s162_s21  ;;  %s4839_s25 = int_to_ptr.vmem [resolvable:$true] %s186_s25 }
  0x6a   :  { %s4375_s27 = scalar_lea.hbm %s5465_s16, 32 }
  0x6b   :  { %p4376_p4 = scmp.ne.s32.totalorder %s5465_s16, %s4375_s27  ;;  %p4379_p5 = scmp.lt.u32.totalorder %s4375_s27, %s5465_s16 }
  0x6d   :  { %p4381_p6 = pnand %p4379_p5, %p4376_p4 }
  0x6f   :  { %4384 = shalt.err (!%p4381_p6)
}
  0x70   :  { %s4385_s14 = scalar_lea.vmem %s163_s21, 32  ;;  %p4390_p8 = scmp.lt.s32.totalorder %s163_s21, %s163_s21 }
  0x71   :  { %p4386_p7 = scmp.ne.s32.totalorder %s163_s21, %s4385_s14  ;;  %p4391_p9 = scmp.lt.s32.totalorder %s4385_s14, %s4385_s14 }
  0x73   :  { %p4392_p10 = por %p4391_p9, %p4390_p8 }
  0x75   :  { %p4393_p11 = pnand %p4392_p10, %p4386_p7 }
  0x77   :  { %4396 = shalt.err (!%p4393_p11)
}
  0x78   :  { %168 = dma.hbm_to_vmem [thread:$0]  %s5465_s16, 32, %s163_s21, [#allocation18], %s4643_s1, %s4643_s1, %s4644_s4  }
  0x79   :  { %s4397_s5 = scalar_lea.hbm %s5467_s18, 32 }
  0x7a   :  { %p4398_p12 = scmp.ne.s32.totalorder %s5467_s18, %s4397_s5  ;;  %p4401_p13 = scmp.lt.u32.totalorder %s4397_s5, %s5467_s18 }
  0x7c   :  { %p4403_p0 = pnand %p4401_p13, %p4398_p12 }
  0x7e   :  { %4406 = shalt.err (!%p4403_p0)
}
  0x7f   :  { %s4407_s27 = scalar_lea.vmem %s4839_s25, 32  ;;  %p4412_p2 = scmp.lt.s32.totalorder %s4839_s25, %s4839_s25 }
  0x80   :  { %p4408_p1 = scmp.ne.s32.totalorder %s4839_s25, %s4407_s27  ;;  %p4413_p3 = scmp.lt.s32.totalorder %s4407_s27, %s4407_s27 }
  0x82   :  { %p4414_p4 = por %p4413_p3, %p4412_p2 }
  0x84   :  { %p4415_p5 = pnand %p4414_p4, %p4408_p1 }
  0x86   :  { %4418 = shalt.err (!%p4415_p5)
}
  0x87   :  { %192 = dma.hbm_to_vmem [thread:$0]  %s5467_s18, 32, %s4839_s25, [#allocation21], %s4643_s1, %s4643_s1, %s4644_s4  }
  0x88   :  { %s4647_s7 = smov [#allocation2]   ;;  %s4648_s14 = smov [#allocation7]  }
  0x89   :  { %s42_s30 = sshll.u32 %s4647_s7, 4  ;;  %s66_s0 = sshll.u32 %s4648_s14, 4  ;;  %s43_s30 = int_to_ptr.vmem [resolvable:$true] %s42_s30  ;;  %s4876_s0 = int_to_ptr.vmem [resolvable:$true] %s66_s0 }
  0x8a   :  { %s5500_s23 = sld [smem:[#allocation35_spill]] }
  0x90   :  { %s4419_s5 = scalar_lea.hbm %s5500_s23, 256 }
  0x91   :  { %p4420_p6 = scmp.ne.s32.totalorder %s5500_s23, %s4419_s5  ;;  %p4423_p7 = scmp.lt.u32.totalorder %s4419_s5, %s5500_s23 }
  0x93   :  { %p4425_p8 = pnand %p4423_p7, %p4420_p6 }
  0x95   :  { %4428 = shalt.err (!%p4425_p8)
}
  0x96   :  { %s4429_s18 = scalar_lea.vmem %s43_s30, 256  ;;  %p4434_p10 = scmp.lt.s32.totalorder %s43_s30, %s43_s30 }
  0x97   :  { %p4430_p9 = scmp.ne.s32.totalorder %s43_s30, %s4429_s18  ;;  %p4435_p11 = scmp.lt.s32.totalorder %s4429_s18, %s4429_s18 }
  0x99   :  { %p4436_p12 = por %p4435_p11, %p4434_p10 }
  0x9b   :  { %p4437_p13 = pnand %p4436_p12, %p4430_p9 }
  0x9d   :  { %4440 = shalt.err (!%p4437_p13)
}
  0x9e   :  { %48 = dma.hbm_to_vmem [thread:$0]  %s5500_s23, 256, %s43_s30, [#allocation3], %s4636_s28, %s4636_s28, %s4637_s29  }
  0x9f   :  { %s5501_s7 = sld [smem:[#allocation37_spill]] }
  0xa5   :  { %s4441_s14 = scalar_lea.hbm %s5501_s7, 1024 }
  0xa6   :  { %p4442_p0 = scmp.ne.s32.totalorder %s5501_s7, %s4441_s14  ;;  %p4445_p1 = scmp.lt.u32.totalorder %s4441_s14, %s5501_s7 }
  0xa8   :  { %p4447_p2 = pnand %p4445_p1, %p4442_p0 }
  0xaa   :  { %4450 = shalt.err (!%p4447_p2)
}
  0xab   :  { %s4451_s22 = scalar_lea.vmem %s4876_s0, 1024  ;;  %p4456_p4 = scmp.lt.s32.totalorder %s4876_s0, %s4876_s0 }
  0xac   :  { %p4452_p3 = scmp.ne.s32.totalorder %s4876_s0, %s4451_s22  ;;  %p4457_p5 = scmp.lt.s32.totalorder %s4451_s22, %s4451_s22 }
  0xae   :  { %p4458_p6 = por %p4457_p5, %p4456_p4 }
  0xb0   :  { %p4459_p7 = pnand %p4458_p6, %p4452_p3 }
  0xb2   :  { %4462 = shalt.err (!%p4459_p7)
}
  0xb3   :  { %s5502_s28 = smov 4   ;;  %s5503_s29 = smov 64  }
  0xb4   :  { %72 = dma.hbm_to_vmem [thread:$0]  %s5501_s7, 1024, %s4876_s0, [#allocation6], %s5503_s29, %s5503_s29, %s5502_s28  }
  0xb5   :  { %s4649_s26 = smov [#allocation10]   ;;  %s4650_s18 = smov [#allocation13]  }
  0xb6   :  { %s93_s2 = sshll.u32 %s4649_s26, 4  ;;  %s118_s25 = sshll.u32 %s4650_s18, 4  ;;  %s94_s2 = int_to_ptr.vmem [resolvable:$true] %s93_s2  ;;  %s4913_s25 = int_to_ptr.vmem [resolvable:$true] %s118_s25 }
  0xb7   :  { %s5504_s21 = sld [smem:[#allocation40_spill]] }
  0xbd   :  { %s4463_s14 = scalar_lea.hbm %s5504_s21, 16 }
  0xbe   :  { %p4464_p8 = scmp.ne.s32.totalorder %s5504_s21, %s4463_s14  ;;  %p4467_p9 = scmp.lt.u32.totalorder %s4463_s14, %s5504_s21 }
  0xc0   :  { %p4469_p10 = pnand %p4467_p9, %p4464_p8 }
  0xc2   :  { %4472 = shalt.err (!%p4469_p10)
}
  0xc3   :  { %s4473_s0 = scalar_lea.vmem %s94_s2, 16  ;;  %s4477_s7 = scalar_lea.vmem %s94_s2, 32 }
  0xc4   :  { %p4474_p11 = scmp.ne.s32.totalorder %s94_s2, %s4473_s0  ;;  %p4478_p12 = scmp.lt.s32.totalorder %s94_s2, %s94_s2 }
  0xc5   :  { %p4479_p13 = scmp.lt.s32.totalorder %s4477_s7, %s4473_s0 }
  0xc7   :  { %p4480_p0 = por %p4479_p13, %p4478_p12 }
  0xc9   :  { %p4481_p1 = pnand %p4480_p0, %p4474_p11 }
  0xcb   :  { %4484 = shalt.err (!%p4481_p1)
}
  0xcc   :  { %96 = dma.hbm_to_vmem [thread:$0]  %s5504_s21, 16, %s94_s2, [#allocation9]  }
  0xcd   :  { %s4485_s18 = scalar_lea.hbm %s5458_s9, 2048 }
  0xce   :  { %p4486_p2 = scmp.ne.s32.totalorder %s5458_s9, %s4485_s18  ;;  %p4489_p3 = scmp.lt.u32.totalorder %s4485_s18, %s5458_s9 }
  0xd0   :  { %p4491_p4 = pnand %p4489_p3, %p4486_p2 }
  0xd2   :  { %4494 = shalt.err (!%p4491_p4)
}
  0xd3   :  { %s4495_s6 = scalar_lea.vmem %s4913_s25, 2048  ;;  %p4500_p6 = scmp.lt.s32.totalorder %s4913_s25, %s4913_s25 }
  0xd4   :  { %p4496_p5 = scmp.ne.s32.totalorder %s4913_s25, %s4495_s6  ;;  %p4501_p7 = scmp.lt.s32.totalorder %s4495_s6, %s4495_s6 }
  0xd6   :  { %p4502_p8 = por %p4501_p7, %p4500_p6 }
  0xd8   :  { %p4503_p9 = pnand %p4502_p8, %p4496_p5 }
  0xda   :  { %4506 = shalt.err (!%p4503_p9)
}
  0xdb   :  { %124 = dma.hbm_to_vmem [thread:$0]  %s5458_s9, 2048, %s4913_s25, [#allocation12], %s5503_s29, %s5503_s29, %s5502_s28  }
  0xdc   :  { %s4651_s5 = smov [#allocation16]   ;;  %s4652_s0 = smov [#allocation19]  }
  0xdd   :  { %s150_s3 = sshll.u32 %s4651_s5, 4  ;;  %s174_s7 = sshll.u32 %s4652_s0, 4  ;;  %s151_s3 = int_to_ptr.vmem [resolvable:$true] %s150_s3  ;;  %s4947_s7 = int_to_ptr.vmem [resolvable:$true] %s174_s7 }
  0xde   :  { %s4507_s23 = scalar_lea.hbm %s5464_s15, 2048 }
  0xdf   :  { %p4508_p10 = scmp.ne.s32.totalorder %s5464_s15, %s4507_s23  ;;  %p4511_p11 = scmp.lt.u32.totalorder %s4507_s23, %s5464_s15 }
  0xe1   :  { %p4513_p12 = pnand %p4511_p11, %p4508_p10 }
  0xe3   :  { %4516 = shalt.err (!%p4513_p12)
}
  0xe4   :  { %s4517_s9 = scalar_lea.vmem %s151_s3, 2048  ;;  %p4522_p0 = scmp.lt.s32.totalorder %s151_s3, %s151_s3 }
  0xe5   :  { %p4518_p13 = scmp.ne.s32.totalorder %s151_s3, %s4517_s9  ;;  %p4523_p1 = scmp.lt.s32.totalorder %s4517_s9, %s4517_s9 }
  0xe7   :  { %p4524_p2 = por %p4523_p1, %p4522_p0 }
  0xe9   :  { %p4525_p3 = pnand %p4524_p2, %p4518_p13 }
  0xeb   :  { %4528 = shalt.err (!%p4525_p3)
}
  0xec   :  { %156 = dma.hbm_to_vmem [thread:$0]  %s5464_s15, 2048, %s151_s3, [#allocation15], %s5503_s29, %s5503_s29, %s5502_s28  }
  0xed   :  { %s4529_s2 = scalar_lea.hbm %s5466_s17, 2048 }
  0xee   :  { %p4530_p4 = scmp.ne.s32.totalorder %s5466_s17, %s4529_s2  ;;  %p4533_p5 = scmp.lt.u32.totalorder %s4529_s2, %s5466_s17 }
  0xf0   :  { %p4535_p6 = pnand %p4533_p5, %p4530_p4 }
  0xf2   :  { %4538 = shalt.err (!%p4535_p6)
}
  0xf3   :  { %s4539_s30 = scalar_lea.vmem %s4947_s7, 2048  ;;  %p4544_p8 = scmp.lt.s32.totalorder %s4947_s7, %s4947_s7 }
  0xf4   :  { %p4540_p7 = scmp.ne.s32.totalorder %s4947_s7, %s4539_s30  ;;  %p4545_p9 = scmp.lt.s32.totalorder %s4539_s30, %s4539_s30 }
  0xf6   :  { %p4546_p10 = por %p4545_p9, %p4544_p8 }
  0xf8   :  { %p4547_p11 = pnand %p4546_p10, %p4540_p7 }
  0xfa   :  { %4550 = shalt.err (!%p4547_p11)
}
  0xfb   :  { %180 = dma.hbm_to_vmem [thread:$0]  %s5466_s17, 2048, %s4947_s7, [#allocation18], %s5503_s29, %s5503_s29, %s5502_s28  }
  0xfc   :  { %s4653_s23 = smov [#allocation22]   ;;  %s4654_s18 = smov [#allocation23]  }
  0xfd   :  { %s198_s26 = sshll.u32 %s4653_s23, 4  ;;  %s210_s27 = sshll.u32 %s4654_s18, 4  ;;  %s199_s26 = int_to_ptr.vmem [resolvable:$true] %s198_s26  ;;  %s4984_s27 = int_to_ptr.vmem [resolvable:$true] %s210_s27 }
  0xfe   :  { %s4551_s25 = scalar_lea.hbm %s5468_s19, 32 }
  0xff   :  { %p4552_p12 = scmp.ne.s32.totalorder %s5468_s19, %s4551_s25  ;;  %p4555_p13 = scmp.lt.u32.totalorder %s4551_s25, %s5468_s19 }
 0x101   :  { %p4557_p0 = pnand %p4555_p13, %p4552_p12 }
 0x103   :  { %4560 = shalt.err (!%p4557_p0)
}
 0x104   :  { %s4561_s17 = scalar_lea.vmem %s199_s26, 32  ;;  %p4566_p2 = scmp.lt.s32.totalorder %s199_s26, %s199_s26 }
 0x105   :  { %p4562_p1 = scmp.ne.s32.totalorder %s199_s26, %s4561_s17  ;;  %p4567_p3 = scmp.lt.s32.totalorder %s4561_s17, %s4561_s17 }
 0x107   :  { %p4568_p4 = por %p4567_p3, %p4566_p2 }
 0x109   :  { %p4569_p5 = pnand %p4568_p4, %p4562_p1 }
 0x10b   :  { %4572 = shalt.err (!%p4569_p5)
}
 0x10c   :  { %204 = dma.hbm_to_vmem [thread:$0]  %s5468_s19, 32, %s199_s26, [#allocation21], %s4643_s1, %s4643_s1, %s4644_s4  }
 0x10d   :  { %s4573_s5 = scalar_lea.hbm %s5469_s20, 32 }
 0x10e   :  { %p4574_p6 = scmp.ne.s32.totalorder %s5469_s20, %s4573_s5  ;;  %p4577_p7 = scmp.lt.u32.totalorder %s4573_s5, %s5469_s20 }
 0x110   :  { %p4579_p8 = pnand %p4577_p7, %p4574_p6 }
 0x112   :  { %4582 = shalt.err (!%p4579_p8)
}
 0x113   :  { %s4583_s3 = scalar_lea.vmem %s4984_s27, 32  ;;  %p4588_p10 = scmp.lt.s32.totalorder %s4984_s27, %s4984_s27 }
 0x114   :  { %p4584_p9 = scmp.ne.s32.totalorder %s4984_s27, %s4583_s3  ;;  %p4589_p11 = scmp.lt.s32.totalorder %s4583_s3, %s4583_s3 }
 0x116   :  { %p4590_p12 = por %p4589_p11, %p4588_p10 }
 0x118   :  { %p4591_p13 = pnand %p4590_p12, %p4584_p9 }
 0x11a   :  { %4594 = shalt.err (!%p4591_p13)
}
 0x11b   :  { %216 = dma.hbm_to_vmem [thread:$0]  %s5469_s20, 32, %s4984_s27, [#allocation24], %s4643_s1, %s4643_s1, %s4644_s4  }
 0x11c   :  { %4617 = dma.done.wait [#allocation3], 256  }
 0x11d   :  { %4618 = vsyncadd [#allocation3], 4294967040 }
 0x11e   :  { %4619 = dma.done.wait [#allocation6], 1280  }
 0x11f   :  { %4620 = vsyncadd [#allocation6], 4294966016 }
 0x120   :  { %4621 = dma.done.wait [#allocation9], 1040  }
 0x121   :  { %4622 = vsyncadd [#allocation9], 4294966256 }
 0x122   :  { %4623 = dma.done.wait [#allocation12], 6144  }
 0x123   :  { %4624 = vsyncadd [#allocation12], 4294961152 }
 0x124   :  { %4625 = dma.done.wait [#allocation15], 2080  }
 0x125   :  { %4626 = vsyncadd [#allocation15], 4294965216 }
 0x126   :  { %4627 = dma.done.wait [#allocation18], 2080  }
 0x127   :  { %4628 = vsyncadd [#allocation18], 4294965216 }
 0x128   :  { %4629 = dma.done.wait [#allocation21], 64  }
 0x129   :  { %4630 = vsyncadd [#allocation21], 4294967232 }
 0x12a   :  { %4631 = dma.done.wait [#allocation24], 32  }
 0x12b   :  { %4632 = vsyncadd [#allocation24], 4294967264  ;;  %v4655_v0 = vmov 0.0   ;;  %vm4656_vm0 = vmmov 0   ;;  %v4103_v1 = vld [vmem:[#allocation7] sm:$0xff]   ;;  %v4104_v2 = vld [vmem:[#allocation7 + $0x8] sm:$0xff]   ;;  %v497_v55 = vlaneseq }
 0x12c   :  { %3699 = vmatprep.subr.bf16.mxu0 %v4655_v0  ;;  %3715 = vmatprep.mubr.msk.bf16.mxu0 %vm4656_vm0, %v4655_v0  ;;  %v4105_v3 = vld [vmem:[#allocation7 + $0x10] sm:$0xff]   ;;  %v4111_v4 = vld [vmem:[#allocation8] sm:$0xff]   ;;  %v4106_v5 = vld [vmem:[#allocation7 + $0x18] sm:$0xff]   ;;  %s5505_s4 = sld [smem:[#allocation38_spill]]  ;;  %v4657_v44 = vmov 0   ;;  %s5506_s27 = sld [smem:[#allocation42_spill]] }
 0x12d   :  { %3719 = vmatprep.subr.bf16.mxu1 %v4655_v0  ;;  %3735 = vmatprep.mubr.msk.bf16.mxu1 %vm4656_vm0, %v4655_v0  ;;  %v4112_v6 = vld [vmem:[#allocation8 + $0x8] sm:$0xff]   ;;  %v4107_v7 = vld [vmem:[#allocation7 + $0x20] sm:$0xff]   ;;  %v4113_v8 = vld [vmem:[#allocation8 + $0x10] sm:$0xff]   ;;  %v5054_v56 = vshrl.u32 %v497_v55, 7  ;;  %v5056_v57 = vand.u32 127, %v497_v55  ;;  %s5512_s7 = sld [smem:[#allocation44_spill]] }
 0x12e   :  { %3700 = vmatpush3.bf16.msra.mxu0 %v4103_v1  ;;  %3720 = vmatpush3.bf16.msra.mxu1 %v4111_v4  ;;  %v4108_v9 = vld [vmem:[#allocation7 + $0x28] sm:$0xff]   ;;  %v4114_v10 = vld [vmem:[#allocation8 + $0x18] sm:$0xff]   ;;  %v4109_v11 = vld [vmem:[#allocation7 + $0x30] sm:$0xff]   ;;  %s4658_s21 = smov [#allocation25]  }
 0x12f   :  { %3701 = vmatprep.subr.bf16.mxu0 %v4655_v0  ;;  %3721 = vmatprep.subr.bf16.mxu1 %v4655_v0  ;;  %v4115_v12 = vld [vmem:[#allocation8 + $0x20] sm:$0xff]   ;;  %v4110_v13 = vld [vmem:[#allocation7 + $0x38] sm:$0xff]   ;;  %v265_v15 = vld [vmem:[#allocation2 + $0x8] sm:$0xff]  ;;  %v563_v58 = vsub.s32 0, %v5054_v56  ;;  %vm512_vm1 = vcmp.ge.s32.totalorder %v5056_v57, 48  ;;  %vm513_vm2 = vcmp.lt.s32.totalorder %v5056_v57, 56 }
 0x130   :  { %v264_v14 = vld [vmem:[#allocation2] sm:$0xff]  ;;  %v4116_v16 = vld [vmem:[#allocation8 + $0x28] sm:$0xff]   ;;  %v4117_v18 = vld [vmem:[#allocation8 + $0x30] sm:$0xff]   ;;  %vm527_vm3 = vcmp.ge.s32.totalorder %v5056_v57, 72  ;;  %vm528_vm4 = vcmp.lt.s32.totalorder %v5056_v57, 80  ;;  %v567_v60 = vsub.s32 1, %v5054_v56 }
 0x131   :  { %v266_v17 = vpack.c.bf16 %v265_v15, %v264_v14  ;;  %v4118_v19 = vld [vmem:[#allocation8 + $0x38] sm:$0xff]   ;;  %v4119_v20 = vld [vmem:[#allocation11] ss:$8 sps:$4 sm:$0xff]   ;;  %v4121_v21 = vld [vmem:[#allocation11 + $0x4] ss:$8 sps:$4 sm:$0xff]   ;;  %vm522_vm5 = vcmp.ge.s32.totalorder %v5056_v57, 64 }
 0x132   :  { %3702 = vmatpush3.bf16.msra.mxu0 %v4104_v2  ;;  %3722 = vmatpush3.bf16.msra.mxu1 %v4112_v6  ;;  %v4124_v22 = vld [vmem:[#allocation11 + $0x14] ss:$8 sps:$4 sm:$0xff]   ;;  %v4122_v23 = vld [vmem:[#allocation11 + $0x10] ss:$8 sps:$4 sm:$0xff]   ;;  %v4127_v24 = vld [vmem:[#allocation11 + $0x24] ss:$8 sps:$4 sm:$0xff]  }
 0x133   :  { %3703 = vmatprep.subr.bf16.mxu0 %v4655_v0  ;;  %3723 = vmatprep.subr.bf16.mxu1 %v4655_v0  ;;  %v4125_v25 = vld [vmem:[#allocation11 + $0x20] ss:$8 sps:$4 sm:$0xff]   ;;  %v4130_v26 = vld [vmem:[#allocation11 + $0x34] ss:$8 sps:$4 sm:$0xff]   ;;  %v4128_v27 = vld [vmem:[#allocation11 + $0x30] ss:$8 sps:$4 sm:$0xff]  }
 0x134   :  { %v4133_v28 = vld [vmem:[#allocation11 + $0x44] ss:$8 sps:$4 sm:$0xff]   ;;  %v4131_v29 = vld [vmem:[#allocation11 + $0x40] ss:$8 sps:$4 sm:$0xff]   ;;  %v4136_v30 = vld [vmem:[#allocation11 + $0x54] ss:$8 sps:$4 sm:$0xff]  }
 0x135   :  { %v4134_v31 = vld [vmem:[#allocation11 + $0x50] ss:$8 sps:$4 sm:$0xff]   ;;  %v3391_v32 = vld [vmem:[%s5505_s4] ss:$0 sm:$0xff]  ;;  %v4139_v40 = vld [vmem:[#allocation11 + $0x64] ss:$8 sps:$4 sm:$0xff]  }
 0x136   :  { %3704 = vmatpush3.bf16.msra.mxu0 %v4105_v3  ;;  %3724 = vmatpush3.bf16.msra.mxu1 %v4113_v8  ;;  %v4137_v41 = vld [vmem:[#allocation11 + $0x60] ss:$8 sps:$4 sm:$0xff]   ;;  %v4142_v42 = vld [vmem:[#allocation11 + $0x74] ss:$8 sps:$4 sm:$0xff]   ;;  %v4140_v43 = vld [vmem:[#allocation11 + $0x70] ss:$8 sps:$4 sm:$0xff]  }
 0x137   :  { %3705 = vmatprep.subr.bf16.mxu0 %v4655_v0  ;;  %3725 = vmatprep.subr.bf16.mxu1 %v4655_v0  ;;  %v3400_v45 = vld [vmem:[#allocation10] ss:$0 sm:$0xff]  ;;  %vm523_vm6 = vcmp.lt.s32.totalorder %v5056_v57, 72  ;;  %vm514_vm7 = vmand %vm512_vm1, %vm513_vm2  ;;  %vm532_vm8 = vcmp.ge.s32.totalorder %v5056_v57, 80  ;;  %vm533_vm9 = vcmp.lt.s32.totalorder %v5056_v57, 88  ;;  %vm537_vm11 = vcmp.ge.s32.totalorder %v5056_v57, 88 }
 0x138   :  { %v559_v59 = vld [vmem:[%s5506_s27] sm:$0x3]  ;;  %vm5073_vm10 = vmand %vm527_vm3, %vm528_vm4  ;;  %vm538_vm12 = vcmp.lt.s32.totalorder %v5056_v57, 96  ;;  %vm499_vm13 = vcmp.lt.s32.totalorder %v5056_v57, 32  ;;  %v5087_v3 = vsel %vm514_vm7, 1.0, %v4655_v0  ;;  %vm502_vm15 = vcmp.ge.s32.totalorder %v5056_v57, 32 }
 0x139   :  { %v564_v61 = vrot.slane %v559_v59, %v563_v58  ;;  %vm5080_vm14 = vmand %vm522_vm5, %vm523_vm6  ;;  %v568_v2 = vrot.slane %v559_v59, %v567_v60  ;;  %vm503_vm1 = vcmp.lt.s32.totalorder %v5056_v57, 40  ;;  %v5099_v8 = vsel %vm5073_vm10, 1.0, %v4655_v0  ;;  %s3375_s5 = sshll.u32 %s4658_s21, 4  ;;  %s3376_s5 = int_to_ptr.vmem [resolvable:$true] %s3375_s5 }
 0x13a   :  { %3706 = vmatpush3.bf16.msra.mxu0 %v4106_v5  ;;  %3726 = vmatpush3.bf16.msra.mxu1 %v4114_v10  ;;  %vm534_vm2 = vmand %vm532_vm8, %vm533_vm9  ;;  %vm704_vm5 = vcmask 130048   ;;  %vm507_vm6 = vcmp.ge.s32.totalorder %v5056_v57, 40  ;;  %vm508_vm7 = vcmp.lt.s32.totalorder %v5056_v57, 48  ;;  %vm517_vm9 = vcmp.ge.s32.totalorder %v5056_v57, 56  ;;  %s4595_s0 = scalar_lea.vmem %s3376_s5, 16  ;;  %s4599_s22 = scalar_lea.vmem %s3376_s5, 32 }
 0x13b   :  { %3707 = vmatprep.subr.bf16.mxu0 %v4655_v0  ;;  %3727 = vmatprep.subr.bf16.mxu1 %v4655_v0  ;;  %vm539_vm3 = vmand %vm537_vm11, %vm538_vm12  ;;  %v5111_v15 = vsel %vm534_vm2, 1.0, %v4655_v0  ;;  %vm518_vm10 = vcmp.lt.s32.totalorder %v5056_v57, 64  ;;  %p4596_p0 = scmp.ne.s32.totalorder %s3376_s5, %s4595_s0  ;;  %p4600_p1 = scmp.lt.s32.totalorder %s3376_s5, %s3376_s5 }
 0x13c   :  { %vm504_vm4 = vmand %vm502_vm15, %vm503_vm1  ;;  %p4601_p2 = scmp.lt.s32.totalorder %s4599_s22, %s4595_s0 }
 0x13d   :  { %vm509_vm8 = vmand %vm507_vm6, %vm508_vm7 }
 0x13e   :  { %3708 = vmatpush3.bf16.msra.mxu0 %v4107_v7  ;;  %3728 = vmatpush3.bf16.msra.mxu1 %v4115_v12  ;;  %v5094_v7 = vsel %vm499_vm13, 1.0, %v4655_v0  ;;  %v5108_v12 = vsel %vm5080_vm14, 1.0, %v4655_v0  ;;  %vm519_vm11 = vmand %vm517_vm9, %vm518_vm10  ;;  %p4602_p3 = por %p4601_p2, %p4600_p1 }
 0x13f   :  { %3709 = vmatprep.subr.bf16.mxu0 %v4655_v0  ;;  %3729 = vmatprep.subr.bf16.mxu1 %v4655_v0 }
 0x140   :  { %p4603_p4 = pnand %p4602_p3, %p4596_p0 }
 0x142   :  { %3710 = vmatpush3.bf16.msra.mxu0 %v4108_v9  ;;  %3730 = vmatpush3.bf16.msra.mxu1 %v4116_v16  ;;  %v5114_v16 = vsel %vm539_vm3, 1.0, %v4655_v0 }
 0x143   :  { %3711 = vmatprep.subr.bf16.mxu0 %v4655_v0  ;;  %3731 = vmatprep.subr.bf16.mxu1 %v4655_v0 }
 0x146   :  { %3712 = vmatpush3.bf16.msra.mxu0 %v4109_v11  ;;  %3732 = vmatpush3.bf16.msra.mxu1 %v4117_v18 }
 0x147   :  { %3713 = vmatprep.subr.bf16.mxu0 %v4655_v0  ;;  %3733 = vmatprep.subr.bf16.mxu1 %v4655_v0 }
 0x14a   :  { %3714 = vmatpush3.bf16.msra.mxu0 %v4110_v13  ;;  %3734 = vmatpush3.bf16.msra.mxu1 %v4118_v19  ;;  %v494_v19 = vld [vmem:[#allocation5] sm:$0xff] }
 0x14b   :  { %3739 = vmatprep.subr.bf16.mxu1 %v4655_v0  ;;  %651 = vmatprep.subr.bf16.mxu0 %v4121_v21 }
 0x14d   :  { %3716 = vmatmul.mubr.bf16.vlgmr.msra.gmra.mrb[0].mxu0 %v266_v17 }
 0x14e   :  { %652 = vmatpush1.bf16.msra.mxu0 %v4119_v20  ;;  %683 = vmatprep.mubr.bf16.mxu0 %v4657_v44  ;;  %v495_v20 = vld [vmem:[#allocation5 + $0x8] sm:$0xff] }
 0x14f   :  { %653 = vmatprep.subr.bf16.mxu0 %v4124_v22 }
 0x152   :  { %654 = vmatpush1.bf16.msra.mxu0 %v4122_v23 }
 0x153   :  { %655 = vmatprep.subr.bf16.mxu0 %v4127_v24  ;;  %v5127_v24 = vsel %vm504_vm4, 1.0, %v4655_v0 }
 0x156   :  { %656 = vmatpush1.bf16.msra.mxu0 %v4125_v25 }
 0x157   :  { %657 = vmatprep.subr.bf16.mxu0 %v4130_v26 }
 0x15a   :  { %658 = vmatpush1.bf16.msra.mxu0 %v4128_v27 }
 0x15b   :  { %659 = vmatprep.subr.bf16.mxu0 %v4133_v28 }
 0x15e   :  { %660 = vmatpush1.bf16.msra.mxu0 %v4131_v29 }
 0x15f   :  { %661 = vmatprep.subr.bf16.mxu0 %v4136_v30 }
 0x162   :  { %662 = vmatpush1.bf16.msra.mxu0 %v4134_v31  ;;  %v5138_v31 = vpack.c.bf16 %v495_v20, %v494_v19 }
 0x163   :  { %663 = vmatprep.subr.bf16.mxu0 %v4139_v40 }
 0x166   :  { %664 = vmatpush1.bf16.msra.mxu0 %v4137_v41 }
 0x167   :  { %665 = vmatprep.subr.bf16.mxu0 %v4142_v42 }
 0x16a   :  { %666 = vmatpush1.bf16.msra.mxu0 %v4140_v43 }
 0x220   :  { %v372_v33 = vpop.f32.mrb[0].mxu0 }
 0x221   :  { %v3717_v34 = vpop.f32.mrb[1].mxu0  ;;  %v373_v36 = vadd.f32 %v3391_v32, %v372_v33 }
 0x222   :  { %v375_v35 = vpop.f32.mrb[2].mxu0 }
 0x223   :  { %v376_v37 = vadd.f32 %v3391_v32, %v375_v35  ;;  %v3718_v38 = vpop.f32.mrb[3].mxu0 }
 0x225   :  { %v379_v39 = vpack.c.bf16 %v376_v37, %v373_v36 }
 0x227   :  { %3736 = vmatmul.mubr.bf16.vlgmr.msra.gmra.mrb[0].mxu1 %v379_v39  ;;  %v5166_v39 = vsel %vm509_vm8, 1.0, %v4655_v0 }
 0x228   :  { %3741 = vmatprep.mubr.msk.bf16.mxu1 %vm4656_vm0, %v4655_v0 }
 0x2fa   :  { %v485_v46 = vpop.f32.mrb[0].mxu1 }
 0x2fb   :  { %v486_v47 = vadd.f32 %v3400_v45, %v485_v46  ;;  %v3737_v48 = vpop.f32.mrb[1].mxu1 }
 0x2fc   :  { %v488_v49 = vpop.f32.mrb[2].mxu1 }
 0x2fd   :  { %v489_v50 = vadd.f32 %v3400_v45, %v488_v49  ;;  %v3738_v51 = vpop.f32.mrb[3].mxu1  ;;  %v5048_v52 = vmax.f32 %v486_v47, 0.0 }
 0x2ff   :  { %v5050_v53 = vmax.f32 %v489_v50, 0.0 }
 0x301   :  { %v542_v54 = vpack.c.bf16 %v5050_v53, %v5048_v52 }
 0x303   :  { %684 = vmatmul.mubr.bf16.vlgmr.msra.gmra.mrb[4].mxu0 %v542_v54 }
 0x3d6   :  { %v685_v1 = vpop.f32.mrb[4].mxu0 }
 0x3d7   :  { %v5091_v4 = vadd.f32 %v685_v1, %v564_v61  ;;  %v687_v5 = vpop.f32.mrb[5].mxu0 }
 0x3d8   :  { %v689_v6 = vpop.f32.mrb[6].mxu0  ;;  %v688_v13 = vadd.f32 %v687_v5, %v568_v2 }
 0x3d9   :  { %v5101_v9 = vadd.f32 %v689_v6, %v564_v61  ;;  %v691_v10 = vpop.f32.mrb[7].mxu0  ;;  %v1137_v11 = vmul.f32 %v5087_v3, %v5091_v4  ;;  %v694_v17 = vmul.f32 %v5094_v7, %v5091_v4  ;;  %v973_v21 = vmul.f32 %v5099_v8, %v5091_v4 }
 0x3da   :  { %v692_v14 = vadd.f32 %v691_v10, %v568_v2  ;;  %v870_v25 = vmul.f32 %v5108_v12, %v5091_v4  ;;  %v1238_v29 = vmul.f32 %v5111_v15, %v5091_v4  ;;  %v1424_v33 = vmul.f32 %v5114_v16, %v5091_v4 }
 0x3db   :  { %3777 = vmatprep.mubr.f32.mxu0 %v1137_v11  ;;  %v695_v18 = vmul.f32 %v5094_v7, %v5101_v9  ;;  %v974_v22 = vmul.f32 %v5099_v8, %v5101_v9  ;;  %v871_v26 = vmul.f32 %v5108_v12, %v5101_v9  ;;  %v1239_v30 = vmul.f32 %v5111_v15, %v5101_v9 }
 0x3dc   :  { %v5124_v23 = vpack.c.bf16 %v692_v14, %v688_v13  ;;  %v1425_v34 = vmul.f32 %v5114_v16, %v5101_v9  ;;  %v769_v37 = vmul.f32 %v5127_v24, %v5091_v4  ;;  %v1138_v38 = vmul.f32 %v5087_v3, %v5101_v9 }
 0x3dd   :  { %v696_v27 = vpack.c.bf16 %v695_v18, %v694_v17  ;;  %v4011_v28 = vpack.c.bf16 %v974_v22, %v973_v21  ;;  %v5140_v32 = vpack.c.bf16 %v871_v26, %v870_v25  ;;  %v5147_v35 = vpack.c.bf16 %v1239_v30, %v1238_v29 }
 0x3de   :  { %4020 = vmatprep.subr.bf16.mxu0 %v5124_v23  ;;  %v5150_v36 = vpack.c.bf16 %v1425_v34, %v1424_v33  ;;  %v770_v40 = vmul.f32 %v5127_v24, %v5101_v9  ;;  %v872_v41 = vmul.f32 %v5166_v39, %v5091_v4  ;;  %v873_v42 = vmul.f32 %v5166_v39, %v5101_v9 }
 0x3df   :  { %3740 = vmatpush3.bf16.msra.mxu1 %v696_v27  ;;  %4022 = vmatpush3.bf16.xpose.msra.mxu0 %v5124_v23 }
 0x3e0   :  { %4004 = vmatprep.subr.bf16.mxu1 %v5124_v23  ;;  %3801 = vmatprep.subr.bf16.mxu0 %v4655_v0 }
 0x3e2   :  { %3742 = vmatmul.mubr.msk.bf16.vlgmr.msra.gmra.mrb[4].mxu1 %vm704_vm5, %v5138_v31 }
 0x3e3   :  { %3749 = vmatprep.mubr.f32.mxu1 %v769_v37 }
 0x3e6   :  { %3778 = vmatmul.mubr.f32.vlgmr.msra.gmra.mrb[8].mxu0 %v1138_v38 }
 0x3e7   :  { %3817 = vmatprep.mubr.msk.bf16.mxu0 %vm4656_vm0, %v4655_v0 }
 0x3e8   :  { %4006 = vmatpush3.bf16.xpose.msra.mxu1 %v5124_v23 }
 0x3e9   :  { %4008 = vmatprep.subr.bf16.mxu1 %v5124_v23 }
 0x3ef   :  { %3750 = vmatmul.mubr.f32.vlgmr.msra.gmra.mrb[8].mxu1 %v770_v40 }
 0x3f0   :  { %4010 = vmatpush3.bf16.xpose.msra.mxu1 %v5124_v23  ;;  %3756 = vmatprep.mubr.f32.mxu1 %v872_v41 }
 0x3f1   :  { %4012 = vmatprep.subr.bf16.mxu1 %v4011_v28 }
 0x3f7   :  { %3757 = vmatmul.mubr.f32.vlgmr.msra.gmra.mrb[10].mxu1 %v873_v42 }
 0x3f8   :  { %4014 = vmatpush3.bf16.msra.mxu1 %v4011_v28 }
 0x3f9   :  { %4016 = vmatprep.subr.bf16.mxu1 %v5140_v32 }
 0x4b5   :  { %v5176_v43 = vpop.f32.mrb[4].mxu1 }
 0x4b6   :  { %v3743_v45 = vpop.f32.mrb[5].mxu1 }
 0x4b7   :  { %v5178_v46 = vpop.f32.mrb[6].mxu1 }
 0x4b8   :  { %v3744_v47 = vpop.f32.mrb[7].mxu1 }
 0x4b9   :  { %v3779_v48 = vpop.f32.mrb[8].mxu0 }
 0x4ba   :  { %v1205_v49 = vpop.f32.mrb[9].mxu0  ;;  %v1215_v61 = vmul.f32 0.35355338, %v3779_v48 }
 0x4bb   :  { %v1214_v11 = vmul.f32 0.35355338, %v1205_v49 }
 0x4bc   :  { %v1219_v10 = vsel %vm704_vm5, %v1215_v61, -inf }
 0x4bd   :  { %v1216_v14 = vsel %vm704_vm5, %v1214_v11, -inf }
 0x4c2   :  { %v3751_v50 = vpop.f32.mrb[8].mxu1 }
 0x4c3   :  { %v837_v51 = vpop.f32.mrb[9].mxu1  ;;  %v847_v55 = vmul.f32 0.35355338, %v3751_v50 }
 0x4c4   :  { %v846_v54 = vmul.f32 0.35355338, %v837_v51 }
 0x4c5   :  { %v851_v63 = vsel %vm704_vm5, %v847_v55, -inf }
 0x4c6   :  { %v848_v59 = vsel %vm704_vm5, %v846_v54, -inf }
 0x4c7   :  { %849 = vmax.xlane.f32.xlu1 %v848_v59 }
 0x4ca   :  { %v3758_v62 = vpop.f32.mrb[10].mxu1 }
 0x4cb   :  { %v940_v1 = vpop.f32.mrb[11].mxu1  ;;  %852 = vmax.xlane.f32.xlu1 %v851_v63  ;;  %v950_v5 = vmul.f32 0.35355338, %v3758_v62 }
 0x4cc   :  { %v949_v2 = vmul.f32 0.35355338, %v940_v1 }
 0x4cd   :  { %v954_v13 = vsel %vm704_vm5, %v950_v5, -inf }
 0x4ce   :  { %v951_v6 = vsel %vm704_vm5, %v949_v2, -inf }
 0x4cf   :  { %952 = vmax.xlane.f32.xlu0 %v951_v6  ;;  %1220 = vmax.xlane.f32.xlu1 %v1219_v10 }
 0x4d3   :  { %955 = vmax.xlane.f32.xlu0 %v954_v13 }
 0x4d7   :  { %1217 = vmax.xlane.f32.xlu0 %v1216_v14 }
 0x554   :  { %v850_v17 = vpop.xlane.xlu1 %849 }
 0x555   :  { %v854_v19 = vsub.f32 %v846_v54, %v850_v17 }
 0x557   :  { %v856_v22 = vmul.f32 1.442695, %v854_v19 }
 0x558   :  { %v853_v18 = vpop.xlane.xlu1 %852 }
 0x559   :  { %v855_v25 = vsub.f32 %v847_v55, %v853_v18 }
 0x55b   :  { %v858_v30 = vmul.f32 1.442695, %v855_v25 }
 0x55c   :  { %v953_v20 = vpop.xlane.xlu0 %952  ;;  %v1221_v27 = vpop.xlane.xlu1 %1220 }
 0x55d   :  { %v957_v21 = vsub.f32 %v949_v2, %v953_v20  ;;  %v1223_v33 = vsub.f32 %v1215_v61, %v1221_v27 }
 0x55f   :  { %v959_v26 = vmul.f32 1.442695, %v957_v21  ;;  %v1226_v40 = vmul.f32 1.442695, %v1223_v33 }
 0x560   :  { %v956_v28 = vpop.xlane.xlu0 %955 }
 0x561   :  { %4223 = vpow2.f32 %v959_v26  ;;  %v958_v29 = vsub.f32 %v950_v5, %v956_v28  ;;  %v5204_v26 = vsel %vm519_vm11, 1.0, %v4655_v0 }
 0x562   :  { %4225 = vpow2.f32 %v856_v22  ;;  %v1323_v28 = vmul.f32 %v5204_v26, %v5091_v4  ;;  %v1324_v57 = vmul.f32 %v5204_v26, %v5101_v9 }
 0x563   :  { %v961_v34 = vmul.f32 1.442695, %v958_v29 }
 0x564   :  { %v1218_v37 = vpop.xlane.xlu0 %1217 }
 0x565   :  { %4227 = vpow2.f32 %v961_v34  ;;  %v1222_v38 = vsub.f32 %v1214_v11, %v1218_v37 }
 0x566   :  { %4229 = vpow2.f32 %v858_v30 }
 0x567   :  { %v1224_v41 = vmul.f32 1.442695, %v1222_v38 }
 0x569   :  { %4231 = vpow2.f32 %v1224_v41 }
 0x56a   :  { %4233 = vpow2.f32 %v1226_v40 }
 0x56b   :  { %v4224_v42 = vpop.eup %4223 }
 0x56c   :  { %v963_v45 = vsel %vm704_vm5, %v4224_v42, 0.0  ;;  %v4226_v47 = vpop.eup %4225 }
 0x56d   :  { %964 = vadd.xlane.f32.xlu0 %v963_v45  ;;  %v860_v50 = vsel %vm704_vm5, %v4226_v47, 0.0 }
 0x56f   :  { %v4228_v48 = vpop.eup %4227 }
 0x570   :  { %v966_v49 = vsel %vm704_vm5, %v4228_v48, 0.0  ;;  %v4230_v51 = vpop.eup %4229 }
 0x571   :  { %967 = vadd.xlane.f32.xlu1 %v966_v49  ;;  %861 = vadd.xlane.f32.xlu0 %v860_v50  ;;  %v863_v59 = vsel %vm704_vm5, %v4230_v51, 0.0  ;;  %v4144_v49 = vld [vmem:[#allocation13 + $0x8] sm:$0xff]   ;;  %v4145_v50 = vld [vmem:[#allocation13 + $0x10] sm:$0xff]  }
 0x573   :  { %v4232_v54 = vpop.eup %4231 }
 0x574   :  { %v1228_v55 = vsel %vm704_vm5, %v4232_v54, 0.0  ;;  %v4234_v61 = vpop.eup %4233 }
 0x575   :  { %1229 = vadd.xlane.f32.xlu0 %v1228_v55  ;;  %864 = vadd.xlane.f32.xlu1 %v863_v59  ;;  %v1231_v62 = vsel %vm704_vm5, %v4234_v61, 0.0  ;;  %v4148_v55 = vld [vmem:[#allocation13 + $0x28] sm:$0xff]   ;;  %v4149_v59 = vld [vmem:[#allocation13 + $0x30] sm:$0xff]  }
 0x579   :  { %1232 = vadd.xlane.f32.xlu1 %v1231_v62 }
 0x5fa   :  { %v965_v63 = vpop.xlane.xlu0 %964 }
 0x5fb   :  { %4235 = vrcp.f32 %v965_v63 }
 0x5fe   :  { %v862_v1 = vpop.xlane.xlu0 %861  ;;  %v968_v2 = vpop.xlane.xlu1 %967 }
 0x5ff   :  { %4237 = vrcp.f32 %v862_v1 }
 0x600   :  { %4239 = vrcp.f32 %v968_v2 }
 0x602   :  { %v865_v5 = vpop.xlane.xlu1 %864  ;;  %v1230_v6 = vpop.xlane.xlu0 %1229 }
 0x603   :  { %4241 = vrcp.f32 %v865_v5 }
 0x604   :  { %4243 = vrcp.f32 %v1230_v6  ;;  %v4150_v6 = vld [vmem:[#allocation13 + $0x38] sm:$0xff]  }
 0x605   :  { %v4236_v10 = vpop.eup %4235 }
 0x606   :  { %v970_v11 = vmul.f32 %v4236_v10, %v4224_v42  ;;  %v1233_v19 = vpop.xlane.xlu1 %1232  ;;  %v4151_v10 = vld [vmem:[#allocation16] sm:$0xff]  }
 0x607   :  { %4245 = vrcp.f32 %v1233_v19 }
 0x608   :  { %3763 = vmatprep.mubr.msk.f32.mxu1 %vm704_vm5, %v970_v11  ;;  %v4152_v11 = vld [vmem:[#allocation16 + $0x8] sm:$0xff]  }
 0x609   :  { %v4238_v13 = vpop.eup %4237 }
 0x60a   :  { %v4240_v14 = vpop.eup %4239  ;;  %v867_v17 = vmul.f32 %v4238_v13, %v4226_v47  ;;  %v4153_v13 = vld [vmem:[#allocation16 + $0x10] sm:$0xff]  }
 0x60b   :  { %v972_v18 = vmul.f32 %v4240_v14, %v4228_v48  ;;  %v4143_v48 = vld [vmem:[#allocation13] sm:$0xff]  }
 0x60c   :  { %3802 = vmatpush3.bf16.msra.mxu0 %v4143_v48  ;;  %v4154_v14 = vld [vmem:[#allocation16 + $0x18] sm:$0xff]  }
 0x60d   :  { %3764 = vmatmul.mubr.msk.f32.vlgmr.msra.gmra.mrb[12].mxu1 %vm704_vm5, %v972_v18  ;;  %v4242_v20 = vpop.eup %4241  ;;  %3803 = vmatprep.subr.bf16.mxu0 %v4655_v0  ;;  %v3437_v48 = vld [vmem:[%s5461_s12] ss:$0 sm:$0xff] }
 0x60e   :  { %4018 = vmatpush3.bf16.msra.mxu1 %v5140_v32  ;;  %3770 = vmatprep.mubr.msk.f32.mxu1 %vm704_vm5, %v867_v17  ;;  %v4244_v21 = vpop.eup %4243  ;;  %v869_v22 = vmul.f32 %v4242_v20, %v4230_v51  ;;  %v4146_v51 = vld [vmem:[#allocation13 + $0x18] sm:$0xff]   ;;  %v4155_v20 = vld [vmem:[#allocation16 + $0x20] sm:$0xff]  }
 0x60f   :  { %4024 = vmatprep.subr.bf16.mxu1 %v5147_v35  ;;  %v1235_v25 = vmul.f32 %v4244_v21, %v4232_v54  ;;  %v4147_v54 = vld [vmem:[#allocation13 + $0x20] sm:$0xff]   ;;  %v4156_v21 = vld [vmem:[#allocation16 + $0x28] sm:$0xff]  }
 0x610   :  { %3804 = vmatpush3.bf16.msra.mxu0 %v4144_v49  ;;  %v3456_v49 = vld [vmem:[#allocation14] ss:$0 sm:$0xff] }
 0x611   :  { %v4246_v32 = vpop.eup %4245  ;;  %3805 = vmatprep.subr.bf16.mxu0 %v4655_v0 }
 0x612   :  { %v1237_v27 = vmul.f32 %v4246_v32, %v4234_v61  ;;  %v4159_v32 = vld [vmem:[#allocation19] sm:$0xff]  }
 0x614   :  { %3806 = vmatpush3.bf16.msra.mxu0 %v4145_v50 }
 0x615   :  { %3771 = vmatmul.mubr.msk.f32.vlgmr.msra.gmra.mrb[12].mxu1 %vm704_vm5, %v869_v22  ;;  %3807 = vmatprep.subr.bf16.mxu0 %v4655_v0  ;;  %v4157_v22 = vld [vmem:[#allocation16 + $0x30] sm:$0xff]  }
 0x616   :  { %4026 = vmatpush3.bf16.msra.mxu1 %v5147_v35  ;;  %3784 = vmatprep.mubr.msk.f32.mxu1 %vm704_vm5, %v1235_v25  ;;  %v4158_v25 = vld [vmem:[#allocation16 + $0x38] sm:$0xff]  }
 0x617   :  { %4028 = vmatprep.subr.bf16.mxu1 %v5124_v23 }
 0x618   :  { %3808 = vmatpush3.bf16.msra.mxu0 %v4146_v51 }
 0x619   :  { %3809 = vmatprep.subr.bf16.mxu0 %v4655_v0 }
 0x61c   :  { %3810 = vmatpush3.bf16.msra.mxu0 %v4147_v54 }
 0x61d   :  { %3785 = vmatmul.mubr.msk.f32.vlgmr.msra.gmra.mrb[12].mxu1 %vm704_vm5, %v1237_v27  ;;  %3811 = vmatprep.subr.bf16.mxu0 %v4655_v0  ;;  %v4160_v27 = vld [vmem:[#allocation19 + $0x8] sm:$0xff]  }
 0x61e   :  { %3791 = vmatprep.mubr.f32.mxu1 %v1323_v28  ;;  %v4161_v28 = vld [vmem:[#allocation19 + $0x10] sm:$0xff]  }
 0x61f   :  { %4030 = vmatpush3.bf16.xpose.msra.mxu1 %v5124_v23 }
 0x620   :  { %4032 = vmatprep.subr.bf16.mxu1 %v5150_v36  ;;  %3812 = vmatpush3.bf16.msra.mxu0 %v4148_v55 }
 0x621   :  { %3813 = vmatprep.subr.bf16.mxu0 %v4655_v0 }
 0x624   :  { %3814 = vmatpush3.bf16.msra.mxu0 %v4149_v59 }
 0x625   :  { %3815 = vmatprep.subr.bf16.mxu0 %v4655_v0 }
 0x626   :  { %3792 = vmatmul.mubr.f32.vlgmr.msra.gmra.mrb[14].mxu1 %v1324_v57  ;;  %v4162_v57 = vld [vmem:[#allocation19 + $0x18] sm:$0xff]  }
 0x627   :  { %4034 = vmatpush3.bf16.msra.mxu1 %v5150_v36 }
 0x628   :  { %3821 = vmatprep.subr.bf16.mxu1 %v4655_v0  ;;  %3816 = vmatpush3.bf16.msra.mxu0 %v4150_v6  ;;  %v4166_v6 = vld [vmem:[#allocation19 + $0x38] sm:$0xff]  }
 0x629   :  { %3841 = vmatprep.subr.bf16.mxu0 %v4655_v0 }
 0x6f9   :  { %v3793_v35 = vpop.f32.mrb[14].mxu1 }
 0x6fa   :  { %v1401_v29 = vmul.f32 0.35355338, %v3793_v35  ;;  %v1391_v30 = vpop.f32.mrb[15].mxu1  ;;  %v4163_v35 = vld [vmem:[#allocation19 + $0x20] sm:$0xff]  }
 0x6fb   :  { %v1400_v33 = vmul.f32 0.35355338, %v1391_v30  ;;  %v3434_v30 = vld [vmem:[%s5457_s8] ss:$0 sm:$0xff] }
 0x6fc   :  { %v1405_v4 = vsel %vm704_vm5, %v1401_v29, -inf }
 0x6fd   :  { %1406 = vmax.xlane.f32.xlu1 %v1405_v4  ;;  %v1402_v34 = vsel %vm704_vm5, %v1400_v33, -inf  ;;  %v746_v4 = vadd.f32 %v3434_v30, %v5178_v46 }
 0x6fe   :  { %1403 = vmax.xlane.f32.xlu0 %v1402_v34  ;;  %v3446_v34 = vld [vmem:[%s5459_s10] ss:$0 sm:$0xff] }
 0x78a   :  { %v1407_v23 = vpop.xlane.xlu1 %1406 }
 0x78b   :  { %v1409_v37 = vsub.f32 %v1401_v29, %v1407_v23  ;;  %v1404_v38 = vpop.xlane.xlu0 %1403  ;;  %v4164_v29 = vld [vmem:[#allocation19 + $0x28] sm:$0xff]  }
 0x78c   :  { %v1408_v40 = vsub.f32 %v1400_v33, %v1404_v38  ;;  %v743_v33 = vadd.f32 %v3434_v30, %v5176_v43  ;;  %v3455_v43 = vld [vmem:[%s5462_s13] ss:$0 sm:$0xff] }
 0x78d   :  { %v1412_v9 = vmul.f32 1.442695, %v1409_v37  ;;  %v3436_v37 = vld [vmem:[%s5460_s11] ss:$0 sm:$0xff] }
 0x78e   :  { %v1410_v41 = vmul.f32 1.442695, %v1408_v40  ;;  %v749_v23 = vadd.f32 %v743_v33, %v5048_v52  ;;  %v750_v40 = vadd.f32 %v746_v4, %v5050_v53  ;;  %v4184_v33 = vld [vmem:[#allocation11 + $0xd4] ss:$8 sps:$4 sm:$0xff]   ;;  %v4182_v4 = vld [vmem:[#allocation11 + $0xd0] ss:$8 sps:$4 sm:$0xff]  }
 0x78f   :  { %4247 = vpow2.f32 %v1412_v9 }
 0x790   :  { %4249 = vpow2.f32 %v1410_v41  ;;  %v759_v50 = vmul.f32 %v3436_v37, %v750_v40  ;;  %v3466_v40 = vld [vmem:[#allocation20] ss:$0 sm:$0xff] }
 0x799   :  { %v4248_v36 = vpop.eup %4247 }
 0x79a   :  { %v4250_v42 = vpop.eup %4249  ;;  %v1417_v45 = vsel %vm704_vm5, %v4248_v36, 0.0 }
 0x79b   :  { %1418 = vadd.xlane.f32.xlu1 %v1417_v45  ;;  %v1414_v47 = vsel %vm704_vm5, %v4250_v42, 0.0 }
 0x79c   :  { %1415 = vadd.xlane.f32.xlu0 %v1414_v47 }
 0x828   :  { %v1419_v61 = vpop.xlane.xlu1 %1418 }
 0x829   :  { %4251 = vrcp.f32 %v1419_v61  ;;  %v1416_v62 = vpop.xlane.xlu0 %1415 }
 0x82a   :  { %4253 = vrcp.f32 %v1416_v62  ;;  %v768_v62 = vadd.f32 %v3437_v48, %v759_v50  ;;  %v3476_v50 = vld [vmem:[#allocation23] ss:$0 sm:$0xff] }
 0x833   :  { %v4252_v63 = vpop.eup %4251 }
 0x834   :  { %v4254_v1 = vpop.eup %4253  ;;  %v1423_v5 = vmul.f32 %v4252_v63, %v4248_v36  ;;  %v758_v36 = vmul.f32 %v3436_v37, %v749_v23  ;;  %v4185_v23 = vld [vmem:[#allocation11 + $0xe0] ss:$8 sps:$4 sm:$0xff]   ;;  %v4188_v37 = vld [vmem:[#allocation11 + $0xf0] ss:$8 sps:$4 sm:$0xff]  }
 0x835   :  { %v1421_v2 = vmul.f32 %v4254_v1, %v4250_v42 }
 0x836   :  { %v767_v55 = vadd.f32 %v3437_v48, %v758_v36 }
 0x837   :  { %3798 = vmatprep.mubr.msk.f32.mxu1 %vm704_vm5, %v1421_v2 }
 0x838   :  { %3799 = vmatmul.mubr.msk.f32.vlgmr.msra.gmra.mrb[12].mxu1 %vm704_vm5, %v1423_v5  ;;  %v4165_v5 = vld [vmem:[#allocation19 + $0x30] sm:$0xff]  }
 0x839   :  { %3837 = vmatprep.mubr.msk.bf16.mxu1 %vm4656_vm0, %v4655_v0  ;;  %3822 = vmatpush3.bf16.msra.mxu1 %v4151_v10  ;;  %v4169_v10 = vld [vmem:[#allocation11 + $0x84] ss:$8 sps:$4 sm:$0xff]  }
 0x83a   :  { %3823 = vmatprep.subr.bf16.mxu1 %v4655_v0 }
 0x83d   :  { %3824 = vmatpush3.bf16.msra.mxu1 %v4152_v11  ;;  %v4172_v11 = vld [vmem:[#allocation11 + $0x94] ss:$8 sps:$4 sm:$0xff]  }
 0x83e   :  { %3825 = vmatprep.subr.bf16.mxu1 %v4655_v0 }
 0x841   :  { %3826 = vmatpush3.bf16.msra.mxu1 %v4153_v13  ;;  %v4170_v13 = vld [vmem:[#allocation11 + $0x90] ss:$8 sps:$4 sm:$0xff]  }
 0x842   :  { %3827 = vmatprep.subr.bf16.mxu1 %v4655_v0 }
 0x845   :  { %3828 = vmatpush3.bf16.msra.mxu1 %v4154_v14  ;;  %v4175_v14 = vld [vmem:[#allocation11 + $0xa4] ss:$8 sps:$4 sm:$0xff]  }
 0x846   :  { %3829 = vmatprep.subr.bf16.mxu1 %v4655_v0 }
 0x849   :  { %3830 = vmatpush3.bf16.msra.mxu1 %v4155_v20  ;;  %v4179_v20 = vld [vmem:[#allocation11 + $0xc0] ss:$8 sps:$4 sm:$0xff]  }
 0x84a   :  { %3831 = vmatprep.subr.bf16.mxu1 %v4655_v0 }
 0x84d   :  { %3832 = vmatpush3.bf16.msra.mxu1 %v4156_v21  ;;  %v3457_v21 = vld [vmem:[#allocation17] ss:$0 sm:$0xff] }
 0x84e   :  { %3833 = vmatprep.subr.bf16.mxu1 %v4655_v0 }
 0x851   :  { %3834 = vmatpush3.bf16.msra.mxu1 %v4157_v22 }
 0x852   :  { %3835 = vmatprep.subr.bf16.mxu1 %v4655_v0 }
 0x855   :  { %3836 = vmatpush3.bf16.msra.mxu1 %v4158_v25 }
 0x856   :  { %2003 = vmatprep.subr.bf16.mxu1 %v4169_v10 }
 0x90b   :  { %v3800_v17 = vpop.f32.mrb[12].mxu1 }
 0x90c   :  { %v1498_v18 = vpop.f32.mrb[13].mxu1 }
 0x90d   :  { %v1509_v19 = vpack.c.bf16 %v3800_v17, %v1498_v18  ;;  %v4173_v17 = vld [vmem:[#allocation11 + $0xa0] ss:$8 sps:$4 sm:$0xff]   ;;  %v4176_v18 = vld [vmem:[#allocation11 + $0xb0] ss:$8 sps:$4 sm:$0xff]  }
 0x90f   :  { %3818 = vmatmul.mubr.bf16.vlgmr.msra.gmra.mrb[12].mxu0 %v1509_v19  ;;  %v4181_v19 = vld [vmem:[#allocation11 + $0xc4] ss:$8 sps:$4 sm:$0xff]  }
 0x910   :  { %3857 = vmatprep.mubr.msk.bf16.mxu0 %vm4656_vm0, %v4655_v0  ;;  %3842 = vmatpush3.bf16.msra.mxu0 %v4159_v32 }
 0x911   :  { %3843 = vmatprep.subr.bf16.mxu0 %v4655_v0 }
 0x914   :  { %3844 = vmatpush3.bf16.msra.mxu0 %v4160_v27 }
 0x915   :  { %3845 = vmatprep.subr.bf16.mxu0 %v4655_v0 }
 0x918   :  { %3846 = vmatpush3.bf16.msra.mxu0 %v4161_v28 }
 0x919   :  { %3847 = vmatprep.subr.bf16.mxu0 %v4655_v0 }
 0x91c   :  { %3848 = vmatpush3.bf16.msra.mxu0 %v4162_v57 }
 0x91d   :  { %3849 = vmatprep.subr.bf16.mxu0 %v4655_v0 }
 0x920   :  { %3850 = vmatpush3.bf16.msra.mxu0 %v4163_v35 }
 0x921   :  { %3851 = vmatprep.subr.bf16.mxu0 %v4655_v0 }
 0x924   :  { %3852 = vmatpush3.bf16.msra.mxu0 %v4164_v29 }
 0x925   :  { %3853 = vmatprep.subr.bf16.mxu0 %v4655_v0 }
 0x928   :  { %3854 = vmatpush3.bf16.msra.mxu0 %v4165_v5 }
 0x929   :  { %3855 = vmatprep.subr.bf16.mxu0 %v4655_v0 }
 0x92c   :  { %3856 = vmatpush3.bf16.msra.mxu0 %v4166_v6 }
 0x92d   :  { %3861 = vmatprep.subr.bf16.mxu0 %v4655_v0 }
 0x9e2   :  { %v1615_v38 = vpop.f32.mrb[12].mxu0 }
 0x9e3   :  { %v1616_v9 = vadd.f32 %v3446_v34, %v1615_v38  ;;  %v3819_v41 = vpop.f32.mrb[13].mxu0  ;;  %v4190_v38 = vld [vmem:[#allocation11 + $0xf4] ss:$8 sps:$4 sm:$0xff]  }
 0x9e4   :  { %v1618_v46 = vpop.f32.mrb[14].mxu0 }
 0x9e5   :  { %v1622_v42 = vadd.f32 %v1616_v9, %v5048_v52  ;;  %v1619_v45 = vadd.f32 %v3446_v34, %v1618_v46  ;;  %v3820_v47 = vpop.f32.mrb[15].mxu0  ;;  %v4187_v34 = vld [vmem:[#allocation11 + $0xe4] ss:$8 sps:$4 sm:$0xff]  }
 0x9e6   :  { %v3475_v46 = vld [vmem:[#allocation22] ss:$0 sm:$0xff] }
 0x9e7   :  { %v1631_v51 = vmul.f32 %v3455_v43, %v1622_v42  ;;  %v1623_v54 = vadd.f32 %v1619_v45, %v5050_v53  ;;  %v4167_v53 = vld [vmem:[#allocation11 + $0x80] ss:$8 sps:$4 sm:$0xff]  }
 0x9e9   :  { %v1640_v59 = vadd.f32 %v3456_v49, %v1631_v51  ;;  %v1632_v61 = vmul.f32 %v3455_v43, %v1623_v54 }
 0x9eb   :  { %v1642_v63 = vadd.f32 %v1640_v59, %v767_v55  ;;  %v1641_v1 = vadd.f32 %v3456_v49, %v1632_v61  ;;  %v3477_v61 = vld [vmem:[%s5506_s27 + $0x2] sm:$0x3] }
 0x9ed   :  { %v5267_v2 = vadd.f32 %v1641_v1, %v768_v62  ;;  %v1916_v62 = vrot.slane %v3477_v61, %v563_v58  ;;  %v1920_v1 = vrot.slane %v3477_v61, %v567_v60 }
 0x9ef   :  { %v1644_v52 = vpack.c.bf16 %v5267_v2, %v1642_v63 }
 0x9f1   :  { %3838 = vmatmul.mubr.bf16.vlgmr.msra.gmra.mrb[16].mxu1 %v1644_v52 }
 0x9f2   :  { %2035 = vmatprep.mubr.bf16.mxu1 %v4657_v44  ;;  %2004 = vmatpush1.bf16.msra.mxu1 %v4167_v53  ;;  %v4178_v44 = vld [vmem:[#allocation11 + $0xb4] ss:$8 sps:$4 sm:$0xff]  }
 0x9f3   :  { %2005 = vmatprep.subr.bf16.mxu1 %v4172_v11 }
 0x9f6   :  { %2006 = vmatpush1.bf16.msra.mxu1 %v4170_v13 }
 0x9f7   :  { %2007 = vmatprep.subr.bf16.mxu1 %v4175_v14 }
 0x9fa   :  { %2008 = vmatpush1.bf16.msra.mxu1 %v4173_v17 }
 0x9fb   :  { %2009 = vmatprep.subr.bf16.mxu1 %v4178_v44 }
 0x9fe   :  { %2010 = vmatpush1.bf16.msra.mxu1 %v4176_v18 }
 0x9ff   :  { %2011 = vmatprep.subr.bf16.mxu1 %v4181_v19 }
 0xa02   :  { %2012 = vmatpush1.bf16.msra.mxu1 %v4179_v20 }
 0xa03   :  { %2013 = vmatprep.subr.bf16.mxu1 %v4184_v33 }
 0xa06   :  { %2014 = vmatpush1.bf16.msra.mxu1 %v4182_v4 }
 0xa07   :  { %2015 = vmatprep.subr.bf16.mxu1 %v4187_v34 }
 0xa0a   :  { %2016 = vmatpush1.bf16.msra.mxu1 %v4185_v23 }
 0xa0b   :  { %2017 = vmatprep.subr.bf16.mxu1 %v4190_v38 }
 0xa0e   :  { %2018 = vmatpush1.bf16.msra.mxu1 %v4188_v37 }
 0xac4   :  { %v1750_v22 = vpop.f32.mrb[16].mxu1 }
 0xac5   :  { %v1751_v25 = vadd.f32 %v3457_v21, %v1750_v22  ;;  %v3839_v32 = vpop.f32.mrb[17].mxu1 }
 0xac6   :  { %v1753_v27 = vpop.f32.mrb[18].mxu1 }
 0xac7   :  { %v1754_v28 = vadd.f32 %v3457_v21, %v1753_v27  ;;  %v3840_v57 = vpop.f32.mrb[19].mxu1  ;;  %v1757_v35 = vmax.f32 %v1751_v25, 0.0 }
 0xac9   :  { %v1758_v29 = vmax.f32 %v1754_v28, 0.0 }
 0xacb   :  { %v1759_v30 = vpack.c.bf16 %v1758_v29, %v1757_v35 }
 0xacd   :  { %3858 = vmatmul.mubr.bf16.vlgmr.msra.gmra.mrb[16].mxu0 %v1759_v30 }
 0xace   :  { %3863 = vmatprep.mubr.msk.bf16.mxu0 %vm4656_vm0, %v4655_v0 }
 0xba0   :  { %v1865_v9 = vpop.f32.mrb[16].mxu0 }
 0xba1   :  { %v1866_v41 = vadd.f32 %v3466_v40, %v1865_v9  ;;  %v3859_v43 = vpop.f32.mrb[17].mxu0 }
 0xba2   :  { %v1868_v36 = vpop.f32.mrb[18].mxu0 }
 0xba3   :  { %v1872_v42 = vadd.f32 %v1866_v41, %v1642_v63  ;;  %v1869_v45 = vadd.f32 %v3466_v40, %v1868_v36  ;;  %v3860_v47 = vpop.f32.mrb[19].mxu0 }
 0xba5   :  { %v1881_v48 = vmul.f32 %v3475_v46, %v1872_v42  ;;  %v1873_v49 = vadd.f32 %v1869_v45, %v5267_v2 }
 0xba7   :  { %v1882_v51 = vmul.f32 %v3475_v46, %v1873_v49  ;;  %v5276_v54 = vadd.f32 %v3476_v50, %v1881_v48 }
 0xba9   :  { %v5278_v55 = vadd.f32 %v3476_v50, %v1882_v51 }
 0xbab   :  { %v1892_v59 = vpack.c.bf16 %v5278_v55, %v5276_v54 }
 0xbad   :  { %2036 = vmatmul.mubr.bf16.vlgmr.msra.gmra.mrb[20].mxu1 %v1892_v59 }
 0xc80   :  { %v2037_v63 = vpop.f32.mrb[20].mxu1 }
 0xc81   :  { %v2038_v2 = vadd.f32 %v2037_v63, %v1916_v62  ;;  %v2039_v52 = vpop.f32.mrb[21].mxu1 }
 0xc82   :  { %v2041_v5 = vpop.f32.mrb[22].mxu1  ;;  %v2040_v11 = vadd.f32 %v2039_v52, %v1920_v1 }
 0xc83   :  { %v2042_v6 = vadd.f32 %v2041_v5, %v1916_v62  ;;  %v2043_v53 = vpop.f32.mrb[23].mxu1  ;;  %v2223_v10 = vmul.f32 %v5166_v39, %v2038_v2  ;;  %v2046_v14 = vmul.f32 %v5094_v7, %v2038_v2  ;;  %v2324_v58 = vmul.f32 %v5099_v8, %v2038_v2 }
 0xc84   :  { %v2044_v13 = vadd.f32 %v2043_v53, %v1920_v1  ;;  %v2221_v60 = vmul.f32 %v5108_v12, %v2038_v2  ;;  %v2589_v21 = vmul.f32 %v5111_v15, %v2038_v2  ;;  %v2120_v27 = vmul.f32 %v5127_v24, %v2038_v2 }
 0xc85   :  { %3878 = vmatprep.mubr.f32.mxu1 %v2223_v10  ;;  %v2047_v17 = vmul.f32 %v5094_v7, %v2042_v6  ;;  %v2325_v44 = vmul.f32 %v5099_v8, %v2042_v6  ;;  %v2222_v18 = vmul.f32 %v5108_v12, %v2042_v6  ;;  %v2590_v25 = vmul.f32 %v5111_v15, %v2042_v6 }
 0xc86   :  { %v4035_v56 = vpack.c.bf16 %v2044_v13, %v2040_v11  ;;  %v2775_v7 = vmul.f32 %v5114_v16, %v2038_v2  ;;  %v2776_v32 = vmul.f32 %v5114_v16, %v2042_v6  ;;  %v2224_v15 = vmul.f32 %v5166_v39, %v2042_v6 }
 0xc87   :  { %v2048_v19 = vpack.c.bf16 %v2047_v17, %v2046_v14  ;;  %v4043_v20 = vpack.c.bf16 %v2325_v44, %v2324_v58  ;;  %v5297_v22 = vpack.c.bf16 %v2222_v18, %v2221_v60  ;;  %v5302_v8 = vpack.c.bf16 %v2590_v25, %v2589_v21 }
 0xc88   :  { %4040 = vmatprep.subr.bf16.mxu1 %v4035_v56  ;;  %v5304_v12 = vpack.c.bf16 %v2776_v32, %v2775_v7  ;;  %v2488_v28 = vmul.f32 %v5087_v3, %v2038_v2  ;;  %v2489_v16 = vmul.f32 %v5087_v3, %v2042_v6  ;;  %v2121_v57 = vmul.f32 %v5127_v24, %v2042_v6 }
 0xc89   :  { %3862 = vmatpush3.bf16.msra.mxu0 %v2048_v19  ;;  %4042 = vmatpush3.bf16.xpose.msra.mxu1 %v4035_v56  ;;  %v2674_v35 = vmul.f32 %v5204_v26, %v2038_v2 }
 0xc8a   :  { %4036 = vmatprep.subr.bf16.mxu0 %v4035_v56  ;;  %4052 = vmatprep.subr.bf16.mxu1 %v4035_v56 }
 0xc8c   :  { %3864 = vmatmul.mubr.msk.bf16.vlgmr.msra.gmra.mrb[20].mxu0 %vm704_vm5, %v5138_v31  ;;  %v2675_v31 = vmul.f32 %v5204_v26, %v2042_v6 }
 0xc8d   :  { %3871 = vmatprep.mubr.f32.mxu0 %v2120_v27 }
 0xc90   :  { %3879 = vmatmul.mubr.f32.vlgmr.msra.gmra.mrb[24].mxu1 %v2224_v15 }
 0xc91   :  { %4054 = vmatpush3.bf16.xpose.msra.mxu1 %v4035_v56  ;;  %3899 = vmatprep.mubr.f32.mxu1 %v2488_v28 }
 0xc92   :  { %4038 = vmatpush3.bf16.xpose.msra.mxu0 %v4035_v56  ;;  %4060 = vmatprep.subr.bf16.mxu1 %v4035_v56 }
 0xc93   :  { %4044 = vmatprep.subr.bf16.mxu0 %v4043_v20 }
 0xc98   :  { %3900 = vmatmul.mubr.f32.vlgmr.msra.gmra.mrb[26].mxu1 %v2489_v16 }
 0xc99   :  { %3872 = vmatmul.mubr.f32.vlgmr.msra.gmra.mrb[10].mxu0 %v2121_v57  ;;  %4062 = vmatpush3.bf16.xpose.msra.mxu1 %v4035_v56 }
 0xc9a   :  { %3913 = vmatprep.mubr.f32.mxu1 %v2674_v35  ;;  %4046 = vmatpush3.bf16.msra.mxu0 %v4043_v20 }
 0xc9b   :  { %4048 = vmatprep.subr.bf16.mxu0 %v5297_v22  ;;  %3943 = vmatprep.subr.bf16.mxu1 %v4655_v0 }
 0xca0   :  { %3914 = vmatmul.mubr.f32.vlgmr.msra.gmra.mrb[28].mxu1 %v2675_v31 }
 0xca1   :  { %3959 = vmatprep.mubr.msk.bf16.mxu1 %vm4656_vm0, %v4655_v0 }
 0xd5f   :  { %v5319_v3 = vpop.f32.mrb[20].mxu0 }
 0xd60   :  { %v3865_v24 = vpop.f32.mrb[21].mxu0 }
 0xd61   :  { %v5321_v39 = vpop.f32.mrb[22].mxu0 }
 0xd62   :  { %v3866_v29 = vpop.f32.mrb[23].mxu0 }
 0xd63   :  { %v3880_v30 = vpop.f32.mrb[24].mxu1 }
 0xd64   :  { %v2301_v33 = vmul.f32 0.35355338, %v3880_v30  ;;  %v2291_v4 = vpop.f32.mrb[25].mxu1 }
 0xd65   :  { %v2300_v34 = vmul.f32 0.35355338, %v2291_v4 }
 0xd66   :  { %v2305_v23 = vsel %vm704_vm5, %v2301_v33, -inf }
 0xd67   :  { %2306 = vmax.xlane.f32.xlu1 %v2305_v23  ;;  %v2302_v37 = vsel %vm704_vm5, %v2300_v34, -inf }
 0xd68   :  { %2303 = vmax.xlane.f32.xlu0 %v2302_v37 }
 0xd6b   :  { %v3901_v26 = vpop.f32.mrb[26].mxu1 }
 0xd6c   :  { %v3873_v38 = vpop.f32.mrb[10].mxu0  ;;  %v2556_v40 = vpop.f32.mrb[27].mxu1  ;;  %v2566_v46 = vmul.f32 0.35355338, %v3901_v26 }
 0xd6d   :  { %v2198_v9 = vmul.f32 0.35355338, %v3873_v38  ;;  %v2188_v41 = vpop.f32.mrb[11].mxu0  ;;  %v2565_v42 = vmul.f32 0.35355338, %v2556_v40 }
 0xd6e   :  { %v2197_v43 = vmul.f32 0.35355338, %v2188_v41  ;;  %v2570_v48 = vsel %vm704_vm5, %v2566_v46, -inf }
 0xd6f   :  { %v2202_v36 = vsel %vm704_vm5, %v2198_v9, -inf  ;;  %v2567_v51 = vsel %vm704_vm5, %v2565_v42, -inf }
 0xd70   :  { %2203 = vmax.xlane.f32.xlu1 %v2202_v36  ;;  %v2199_v45 = vsel %vm704_vm5, %v2197_v43, -inf }
 0xd71   :  { %2200 = vmax.xlane.f32.xlu0 %v2199_v45 }
 0xd73   :  { %v3915_v47 = vpop.f32.mrb[28].mxu1 }
 0xd74   :  { %v2752_v49 = vmul.f32 0.35355338, %v3915_v47  ;;  %v2742_v50 = vpop.f32.mrb[29].mxu1  ;;  %2571 = vmax.xlane.f32.xlu1 %v2570_v48 }
 0xd75   :  { %v2751_v59 = vmul.f32 0.35355338, %v2742_v50  ;;  %2568 = vmax.xlane.f32.xlu0 %v2567_v51 }
 0xd76   :  { %v2756_v61 = vsel %vm704_vm5, %v2752_v49, -inf }
 0xd77   :  { %v2753_v62 = vsel %vm704_vm5, %v2751_v59, -inf }
 0xd78   :  { %2757 = vmax.xlane.f32.xlu1 %v2756_v61 }
 0xd79   :  { %2754 = vmax.xlane.f32.xlu0 %v2753_v62 }
 0xdf4   :  { %v2307_v63 = vpop.xlane.xlu1 %2306 }
 0xdf5   :  { %v2309_v1 = vsub.f32 %v2301_v33, %v2307_v63  ;;  %v2304_v2 = vpop.xlane.xlu0 %2303 }
 0xdf6   :  { %v2308_v52 = vsub.f32 %v2300_v34, %v2304_v2 }
 0xdf7   :  { %v2312_v5 = vmul.f32 1.442695, %v2309_v1 }
 0xdf8   :  { %v2310_v6 = vmul.f32 1.442695, %v2308_v52 }
 0xdf9   :  { %4255 = vpow2.f32 %v2312_v5 }
 0xdfa   :  { %4257 = vpow2.f32 %v2310_v6 }
 0xdfd   :  { %v2204_v53 = vpop.xlane.xlu1 %2203 }
 0xdfe   :  { %v2206_v10 = vsub.f32 %v2198_v9, %v2204_v53  ;;  %v2201_v11 = vpop.xlane.xlu0 %2200  ;;  %v4191_v53 = vld [vmem:[#allocation13 + $0x40] sm:$0xff]  }
 0xdff   :  { %v2205_v13 = vsub.f32 %v2197_v43, %v2201_v11  ;;  %v4193_v11 = vld [vmem:[#allocation13 + $0x50] sm:$0xff]  }
 0xe00   :  { %v2209_v14 = vmul.f32 1.442695, %v2206_v10  ;;  %v4192_v10 = vld [vmem:[#allocation13 + $0x48] sm:$0xff]  }
 0xe01   :  { %v2207_v17 = vmul.f32 1.442695, %v2205_v13  ;;  %v2572_v58 = vpop.xlane.xlu1 %2571  ;;  %v4195_v13 = vld [vmem:[#allocation13 + $0x60] sm:$0xff]  }
 0xe02   :  { %4259 = vpow2.f32 %v2209_v14  ;;  %v2574_v44 = vsub.f32 %v2566_v46, %v2572_v58  ;;  %v2569_v56 = vpop.xlane.xlu0 %2568  ;;  %v4196_v14 = vld [vmem:[#allocation13 + $0x68] sm:$0xff]   ;;  %v4198_v58 = vld [vmem:[#allocation13 + $0x78] sm:$0xff]  }
 0xe03   :  { %v4256_v60 = vpop.eup %4255  ;;  %4261 = vpow2.f32 %v2207_v17  ;;  %v2573_v18 = vsub.f32 %v2565_v42, %v2569_v56  ;;  %v4197_v17 = vld [vmem:[#allocation13 + $0x70] sm:$0xff]  }
 0xe04   :  { %v4258_v19 = vpop.eup %4257  ;;  %v2577_v20 = vmul.f32 1.442695, %v2574_v44  ;;  %v2317_v21 = vsel %vm704_vm5, %v4256_v60, 0.0  ;;  %v4199_v44 = vld [vmem:[#allocation16 + $0x40] sm:$0xff]   ;;  %v4200_v56 = vld [vmem:[#allocation16 + $0x48] sm:$0xff]  }
 0xe05   :  { %v2575_v25 = vmul.f32 1.442695, %v2573_v18  ;;  %2318 = vadd.xlane.f32.xlu1 %v2317_v21  ;;  %v2758_v7 = vpop.xlane.xlu1 %2757  ;;  %v2314_v32 = vsel %vm704_vm5, %v4258_v19, 0.0  ;;  %3944 = vmatpush3.bf16.msra.mxu1 %v4199_v44  ;;  %v4202_v18 = vld [vmem:[#allocation16 + $0x58] sm:$0xff]  }
 0xe06   :  { %4263 = vpow2.f32 %v2577_v20  ;;  %v2760_v27 = vsub.f32 %v2752_v49, %v2758_v7  ;;  %2315 = vadd.xlane.f32.xlu0 %v2314_v32  ;;  %v2755_v15 = vpop.xlane.xlu0 %2754  ;;  %3945 = vmatprep.subr.bf16.mxu1 %v4655_v0  ;;  %v4204_v7 = vld [vmem:[#allocation16 + $0x68] sm:$0xff]   ;;  %v4205_v32 = vld [vmem:[#allocation16 + $0x70] sm:$0xff]  }
 0xe07   :  { %4265 = vpow2.f32 %v2575_v25  ;;  %v2759_v28 = vsub.f32 %v2751_v59, %v2755_v15  ;;  %v4203_v25 = vld [vmem:[#allocation16 + $0x60] sm:$0xff]  }
 0xe08   :  { %v2763_v16 = vmul.f32 1.442695, %v2760_v27  ;;  %v4206_v27 = vld [vmem:[#allocation16 + $0x78] sm:$0xff]   ;;  %v4207_v15 = vld [vmem:[#allocation19 + $0x40] sm:$0xff]  }
 0xe09   :  { %v2761_v57 = vmul.f32 1.442695, %v2759_v28  ;;  %3946 = vmatpush3.bf16.msra.mxu1 %v4200_v56  ;;  %v4208_v28 = vld [vmem:[#allocation19 + $0x48] sm:$0xff]  }
 0xe0a   :  { %4267 = vpow2.f32 %v2763_v16  ;;  %3947 = vmatprep.subr.bf16.mxu1 %v4655_v0  ;;  %v4209_v16 = vld [vmem:[#allocation19 + $0x50] sm:$0xff]  }
 0xe0b   :  { %4269 = vpow2.f32 %v2761_v57  ;;  %v4210_v57 = vld [vmem:[#allocation19 + $0x58] sm:$0xff]  }
 0xe0c   :  { %v4260_v35 = vpop.eup %4259 }
 0xe0d   :  { %v4262_v31 = vpop.eup %4261  ;;  %v2214_v24 = vsel %vm704_vm5, %v4260_v35, 0.0 }
 0xe0e   :  { %2215 = vadd.xlane.f32.xlu1 %v2214_v24  ;;  %v2211_v29 = vsel %vm704_vm5, %v4262_v31, 0.0  ;;  %v3495_v24 = vld [vmem:[%s5457_s8 + $0x1] ss:$0 sm:$0xff] }
 0xe0f   :  { %2212 = vadd.xlane.f32.xlu0 %v2211_v29  ;;  %v2092_v29 = vadd.f32 %v3495_v24, %v5319_v3  ;;  %v3520_v3 = vld [vmem:[%s5462_s13 + $0x1] ss:$0 sm:$0xff]  ;;  %s5511_s13 = sld [smem:[#allocation43_spill]] }
 0xe10   :  { %v4264_v30 = vpop.eup %4263 }
 0xe11   :  { %v4266_v33 = vpop.eup %4265  ;;  %v2582_v4 = vsel %vm704_vm5, %v4264_v30, 0.0 }
 0xe12   :  { %2583 = vadd.xlane.f32.xlu1 %v2582_v4  ;;  %v2579_v34 = vsel %vm704_vm5, %v4266_v33, 0.0  ;;  %v2098_v4 = vadd.f32 %v2092_v29, %v5276_v54 }
 0xe13   :  { %2580 = vadd.xlane.f32.xlu0 %v2579_v34  ;;  %v3498_v34 = vld [vmem:[%s5460_s11 + $0x1] ss:$0 sm:$0xff] }
 0xe14   :  { %v4268_v23 = vpop.eup %4267 }
 0xe15   :  { %v4270_v37 = vpop.eup %4269  ;;  %v2768_v26 = vsel %vm704_vm5, %v4268_v23, 0.0  ;;  %v4220_v44 = vld [vmem:[%s5511_s13 + $0x28] sm:$0xff]   ;;  %v4221_v56 = vld [vmem:[%s5511_s13 + $0x30] sm:$0xff]  }
 0xe16   :  { %2769 = vadd.xlane.f32.xlu1 %v2768_v26  ;;  %v2765_v38 = vsel %vm704_vm5, %v4270_v37, 0.0 }
 0xe17   :  { %2766 = vadd.xlane.f32.xlu0 %v2765_v38 }
 0xe92   :  { %v2319_v40 = vpop.xlane.xlu1 %2318 }
 0xe93   :  { %4271 = vrcp.f32 %v2319_v40  ;;  %v2316_v9 = vpop.xlane.xlu0 %2315  ;;  %v2108_v40 = vmul.f32 %v3498_v34, %v2098_v4 }
 0xe94   :  { %4273 = vrcp.f32 %v2316_v9 }
 0xe9b   :  { %v2216_v41 = vpop.xlane.xlu1 %2215 }
 0xe9c   :  { %4275 = vrcp.f32 %v2216_v41  ;;  %v2213_v43 = vpop.xlane.xlu0 %2212 }
 0xe9d   :  { %v4272_v46 = vpop.eup %4271  ;;  %4277 = vrcp.f32 %v2213_v43 }
 0xe9e   :  { %v4274_v36 = vpop.eup %4273  ;;  %v2323_v45 = vmul.f32 %v4272_v46, %v4256_v60  ;;  %v4201_v60 = vld [vmem:[#allocation16 + $0x50] sm:$0xff]   ;;  %v3500_v46 = vld [vmem:[%s5461_s12 + $0x1] ss:$0 sm:$0xff] }
 0xe9f   :  { %v2321_v42 = vmul.f32 %v4274_v36, %v4258_v19  ;;  %v2584_v48 = vpop.xlane.xlu1 %2583  ;;  %3948 = vmatpush3.bf16.msra.mxu1 %v4201_v60  ;;  %v3521_v36 = vld [vmem:[#allocation14 + $0x1] ss:$0 sm:$0xff]  ;;  %v4222_v60 = vld [vmem:[%s5511_s13 + $0x38] sm:$0xff]  }
 0xea0   :  { %v2581_v47 = vpop.xlane.xlu0 %2580  ;;  %3949 = vmatprep.subr.bf16.mxu1 %v4655_v0 }
 0xea1   :  { %4279 = vrcp.f32 %v2581_v47  ;;  %3885 = vmatprep.mubr.msk.f32.mxu0 %vm704_vm5, %v2321_v42 }
 0xea2   :  { %3886 = vmatmul.mubr.msk.f32.vlgmr.msra.gmra.mrb[24].mxu0 %vm704_vm5, %v2323_v45  ;;  %4281 = vrcp.f32 %v2584_v48  ;;  %v2118_v48 = vadd.f32 %v3500_v46, %v2108_v40 }
 0xea3   :  { %4050 = vmatpush3.bf16.msra.mxu0 %v5297_v22  ;;  %v2770_v62 = vpop.xlane.xlu1 %2769  ;;  %3950 = vmatpush3.bf16.msra.mxu1 %v4202_v18  ;;  %v3531_v18 = vld [vmem:[#allocation20 + $0x1] ss:$0 sm:$0xff] }
 0xea4   :  { %4056 = vmatprep.subr.bf16.mxu0 %v5302_v8  ;;  %v2767_v49 = vpop.xlane.xlu0 %2766  ;;  %3951 = vmatprep.subr.bf16.mxu1 %v4655_v0 }
 0xea5   :  { %4283 = vrcp.f32 %v2767_v49 }
 0xea6   :  { %v4276_v50 = vpop.eup %4275  ;;  %4285 = vrcp.f32 %v2770_v62 }
 0xea7   :  { %v4278_v51 = vpop.eup %4277  ;;  %v2220_v61 = vmul.f32 %v4276_v50, %v4260_v35  ;;  %3952 = vmatpush3.bf16.msra.mxu1 %v4203_v25  ;;  %v4211_v35 = vld [vmem:[#allocation19 + $0x60] sm:$0xff]  }
 0xea8   :  { %v2218_v59 = vmul.f32 %v4278_v51, %v4262_v31  ;;  %3953 = vmatprep.subr.bf16.mxu1 %v4655_v0  ;;  %v4212_v31 = vld [vmem:[#allocation19 + $0x68] sm:$0xff]   ;;  %v3540_v25 = vld [vmem:[#allocation22 + $0x1] ss:$0 sm:$0xff] }
 0xeaa   :  { %3892 = vmatprep.mubr.msk.f32.mxu0 %vm704_vm5, %v2218_v59 }
 0xeab   :  { %v4280_v63 = vpop.eup %4279  ;;  %3893 = vmatmul.mubr.msk.f32.vlgmr.msra.gmra.mrb[24].mxu0 %vm704_vm5, %v2220_v61  ;;  %3954 = vmatpush3.bf16.msra.mxu1 %v4204_v7 }
 0xeac   :  { %4058 = vmatpush3.bf16.msra.mxu0 %v5302_v8  ;;  %v2586_v1 = vmul.f32 %v4280_v63, %v4266_v33  ;;  %v4282_v22 = vpop.eup %4281  ;;  %3955 = vmatprep.subr.bf16.mxu1 %v4655_v0  ;;  %v3510_v33 = vld [vmem:[%s5459_s10 + $0x1] ss:$0 sm:$0xff] }
 0xead   :  { %4064 = vmatprep.subr.bf16.mxu0 %v5304_v12  ;;  %v2588_v52 = vmul.f32 %v4282_v22, %v4264_v30  ;;  %v2095_v30 = vadd.f32 %v3495_v24, %v5321_v39  ;;  %v3522_v22 = vld [vmem:[#allocation17 + $0x1] ss:$0 sm:$0xff] }
 0xeae   :  { %3906 = vmatprep.mubr.msk.f32.mxu0 %vm704_vm5, %v2586_v1  ;;  %v4214_v1 = vld [vmem:[#allocation19 + $0x78] sm:$0xff]  }
 0xeaf   :  { %v4284_v2 = vpop.eup %4283  ;;  %3956 = vmatpush3.bf16.msra.mxu1 %v4205_v32 }
 0xeb0   :  { %v2772_v5 = vmul.f32 %v4284_v2, %v4270_v37  ;;  %v4286_v6 = vpop.eup %4285  ;;  %3957 = vmatprep.subr.bf16.mxu1 %v4655_v0  ;;  %v2099_v37 = vadd.f32 %v2095_v30, %v5278_v55 }
 0xeb1   :  { %v2774_v8 = vmul.f32 %v4286_v6, %v4268_v23 }
 0xeb2   :  { %v2109_v42 = vmul.f32 %v3498_v34, %v2099_v37 }
 0xeb3   :  { %3907 = vmatmul.mubr.msk.f32.vlgmr.msra.gmra.mrb[24].mxu0 %vm704_vm5, %v2588_v52  ;;  %3958 = vmatpush3.bf16.msra.mxu1 %v4206_v27 }
 0xeb4   :  { %4066 = vmatpush3.bf16.msra.mxu0 %v5304_v12  ;;  %3920 = vmatprep.mubr.msk.f32.mxu0 %vm704_vm5, %v2772_v5  ;;  %v4194_v12 = vld [vmem:[#allocation13 + $0x58] sm:$0xff]   ;;  %v2119_v51 = vadd.f32 %v3500_v46, %v2109_v42 }
 0xeb5   :  { %3923 = vmatprep.subr.bf16.mxu0 %v4655_v0  ;;  %3983 = vmatprep.subr.bf16.mxu1 %v4655_v0 }
 0xebb   :  { %3921 = vmatmul.mubr.msk.f32.vlgmr.msra.gmra.mrb[24].mxu0 %vm704_vm5, %v2774_v8 }
 0xebc   :  { %3924 = vmatpush3.bf16.msra.mxu0 %v4191_v53  ;;  %3939 = vmatprep.mubr.msk.bf16.mxu0 %vm4656_vm0, %v4655_v0 }
 0xebd   :  { %3925 = vmatprep.subr.bf16.mxu0 %v4655_v0 }
 0xec0   :  { %3926 = vmatpush3.bf16.msra.mxu0 %v4192_v10 }
 0xec1   :  { %3927 = vmatprep.subr.bf16.mxu0 %v4655_v0 }
 0xec4   :  { %3928 = vmatpush3.bf16.msra.mxu0 %v4193_v11 }
 0xec5   :  { %3929 = vmatprep.subr.bf16.mxu0 %v4655_v0 }
 0xec8   :  { %3930 = vmatpush3.bf16.msra.mxu0 %v4194_v12 }
 0xec9   :  { %3931 = vmatprep.subr.bf16.mxu0 %v4655_v0 }
 0xecc   :  { %3932 = vmatpush3.bf16.msra.mxu0 %v4195_v13  ;;  %v4216_v13 = vld [vmem:[%s5511_s13 + $0x8] sm:$0xff]  }
 0xecd   :  { %3933 = vmatprep.subr.bf16.mxu0 %v4655_v0 }
 0xed0   :  { %3934 = vmatpush3.bf16.msra.mxu0 %v4196_v14  ;;  %v4217_v14 = vld [vmem:[%s5511_s13 + $0x10] sm:$0xff]  }
 0xed1   :  { %3935 = vmatprep.subr.bf16.mxu0 %v4655_v0 }
 0xed4   :  { %3936 = vmatpush3.bf16.msra.mxu0 %v4197_v17  ;;  %v4218_v17 = vld [vmem:[%s5511_s13 + $0x18] sm:$0xff]  }
 0xed5   :  { %3937 = vmatprep.subr.bf16.mxu0 %v4655_v0 }
 0xed8   :  { %3938 = vmatpush3.bf16.msra.mxu0 %v4198_v58  ;;  %v4219_v58 = vld [vmem:[%s5511_s13 + $0x20] sm:$0xff]  }
 0xed9   :  { %3963 = vmatprep.subr.bf16.mxu0 %v4655_v0 }
 0xf8e   :  { %v3922_v19 = vpop.f32.mrb[24].mxu0 }
 0xf8f   :  { %v2849_v20 = vpop.f32.mrb[25].mxu0 }
 0xf90   :  { %v2860_v21 = vpack.c.bf16 %v3922_v19, %v2849_v20 }
 0xf92   :  { %3940 = vmatmul.mubr.bf16.vlgmr.msra.gmra.mrb[28].mxu0 %v2860_v21 }
 0xf93   :  { %3979 = vmatprep.mubr.msk.bf16.mxu0 %vm4656_vm0, %v4655_v0  ;;  %3964 = vmatpush3.bf16.msra.mxu0 %v4207_v15 }
 0xf94   :  { %3965 = vmatprep.subr.bf16.mxu0 %v4655_v0 }
 0xf97   :  { %3966 = vmatpush3.bf16.msra.mxu0 %v4208_v28 }
 0xf98   :  { %3967 = vmatprep.subr.bf16.mxu0 %v4655_v0 }
 0xf9b   :  { %3968 = vmatpush3.bf16.msra.mxu0 %v4209_v16 }
 0xf9c   :  { %3969 = vmatprep.subr.bf16.mxu0 %v4655_v0 }
 0xf9f   :  { %3970 = vmatpush3.bf16.msra.mxu0 %v4210_v57  ;;  %v3541_v57 = vld [vmem:[#allocation23 + $0x1] ss:$0 sm:$0xff] }
 0xfa0   :  { %3971 = vmatprep.subr.bf16.mxu0 %v4655_v0 }
 0xfa3   :  { %3972 = vmatpush3.bf16.msra.mxu0 %v4211_v35 }
 0xfa4   :  { %3973 = vmatprep.subr.bf16.mxu0 %v4655_v0 }
 0xfa7   :  { %3974 = vmatpush3.bf16.msra.mxu0 %v4212_v31 }
 0xfa8   :  { %3975 = vmatprep.subr.bf16.mxu0 %v4655_v0 }
0x1065   :  { %v2968_v23 = vpop.f32.mrb[28].mxu0 }
0x1066   :  { %v2969_v26 = vadd.f32 %v3510_v33, %v2968_v23  ;;  %v3941_v38 = vpop.f32.mrb[29].mxu0 }
0x1067   :  { %v2971_v39 = vpop.f32.mrb[30].mxu0  ;;  %v3279_v38 = vld [vmem:[%s5512_s7] sm:$0x1] }
0x1068   :  { %v2975_v9 = vadd.f32 %v2969_v26, %v5276_v54  ;;  %v2972_v41 = vadd.f32 %v3510_v33, %v2971_v39  ;;  %v3942_v43 = vpop.f32.mrb[31].mxu0  ;;  %v4213_v54 = vld [vmem:[#allocation19 + $0x70] sm:$0xff]  }
0x1069   :  { %3976 = vmatpush3.bf16.msra.mxu0 %v4213_v54 }
0x106a   :  { %v2985_v45 = vmul.f32 %v3520_v3, %v2975_v9  ;;  %v2976_v47 = vadd.f32 %v2972_v41, %v5278_v55  ;;  %3977 = vmatprep.subr.bf16.mxu0 %v4655_v0  ;;  %v4215_v55 = vld [vmem:[%s5511_s13] sm:$0xff]  }
0x106c   :  { %v2995_v49 = vadd.f32 %v3521_v36, %v2985_v45  ;;  %v2986_v50 = vmul.f32 %v3520_v3, %v2976_v47 }
0x106d   :  { %3978 = vmatpush3.bf16.msra.mxu0 %v4214_v1 }
0x106e   :  { %v2997_v59 = vadd.f32 %v2995_v49, %v2118_v48  ;;  %v2996_v61 = vadd.f32 %v3521_v36, %v2986_v50 }
0x1070   :  { %v2998_v62 = vadd.f32 %v2996_v61, %v2119_v51 }
0x1072   :  { %v2999_v63 = vpack.c.bf16 %v2998_v62, %v2997_v59 }
0x1074   :  { %3960 = vmatmul.mubr.bf16.vlgmr.msra.gmra.mrb[32].mxu1 %v2999_v63 }
0x1075   :  { %3999 = vmatprep.mubr.msk.bf16.mxu1 %vm4656_vm0, %v4655_v0  ;;  %3984 = vmatpush3.bf16.msra.mxu1 %v4215_v55 }
0x1076   :  { %3985 = vmatprep.subr.bf16.mxu1 %v4655_v0 }
0x1079   :  { %3986 = vmatpush3.bf16.msra.mxu1 %v4216_v13 }
0x107a   :  { %3987 = vmatprep.subr.bf16.mxu1 %v4655_v0 }
0x107d   :  { %3988 = vmatpush3.bf16.msra.mxu1 %v4217_v14 }
0x107e   :  { %3989 = vmatprep.subr.bf16.mxu1 %v4655_v0 }
0x1081   :  { %3990 = vmatpush3.bf16.msra.mxu1 %v4218_v17 }
0x1082   :  { %3991 = vmatprep.subr.bf16.mxu1 %v4655_v0 }
0x1085   :  { %3992 = vmatpush3.bf16.msra.mxu1 %v4219_v58 }
0x1086   :  { %3993 = vmatprep.subr.bf16.mxu1 %v4655_v0 }
0x1089   :  { %3994 = vmatpush3.bf16.msra.mxu1 %v4220_v44 }
0x108a   :  { %3995 = vmatprep.subr.bf16.mxu1 %v4655_v0 }
0x108d   :  { %3996 = vmatpush3.bf16.msra.mxu1 %v4221_v56 }
0x108e   :  { %3997 = vmatprep.subr.bf16.mxu1 %v4655_v0 }
0x1091   :  { %3998 = vmatpush3.bf16.msra.mxu1 %v4222_v60 }
0x1147   :  { %v3107_v2 = vpop.f32.mrb[32].mxu1 }
0x1148   :  { %v3108_v52 = vadd.f32 %v3522_v22, %v3107_v2  ;;  %v3961_v5 = vpop.f32.mrb[33].mxu1 }
0x1149   :  { %v3110_v6 = vpop.f32.mrb[34].mxu1 }
0x114a   :  { %v3111_v53 = vadd.f32 %v3522_v22, %v3110_v6  ;;  %v3962_v8 = vpop.f32.mrb[35].mxu1  ;;  %v3114_v10 = vmax.f32 %v3108_v52, 0.0 }
0x114c   :  { %v3115_v11 = vmax.f32 %v3111_v53, 0.0 }
0x114e   :  { %v3116_v12 = vpack.c.bf16 %v3115_v11, %v3114_v10 }
0x1150   :  { %3980 = vmatmul.mubr.bf16.vlgmr.msra.gmra.mrb[32].mxu0 %v3116_v12 }
0x1223   :  { %v3224_v19 = vpop.f32.mrb[32].mxu0 }
0x1224   :  { %v3225_v20 = vadd.f32 %v3531_v18, %v3224_v19  ;;  %v3981_v21 = vpop.f32.mrb[33].mxu0 }
0x1225   :  { %v3227_v7 = vpop.f32.mrb[34].mxu0 }
0x1226   :  { %v3231_v32 = vadd.f32 %v3225_v20, %v2997_v59  ;;  %v3228_v27 = vadd.f32 %v3531_v18, %v3227_v7  ;;  %v3982_v15 = vpop.f32.mrb[35].mxu0 }
0x1228   :  { %v3241_v28 = vmul.f32 %v3540_v25, %v3231_v32  ;;  %v3232_v16 = vadd.f32 %v3228_v27, %v2998_v62 }
0x122a   :  { %v3242_v35 = vmul.f32 %v3540_v25, %v3232_v16  ;;  %v3251_v31 = vadd.f32 %v3541_v57, %v3241_v28 }
0x122c   :  { %v3252_v24 = vadd.f32 %v3541_v57, %v3242_v35 }
0x122e   :  { %v3253_v29 = vadd.f32 %v3252_v24, %v3251_v31 }
0x1230   :  { %v3254_v30 = vrot.slane %v3253_v29, 4 }
0x1232   :  { %v3255_v33 = vadd.f32 %v3254_v30, %v3253_v29 }
0x1234   :  { %v3256_v0 = vrot.slane %v3255_v33, 2 }
0x1236   :  { %v3257_v4 = vadd.f32 %v3256_v0, %v3255_v33 }
0x1238   :  { %v3258_v34 = vrot.slane %v3257_v4, 1 }
0x123a   :  { %v3259_v23 = vadd.f32 %v3258_v34, %v3257_v4 }
0x123c   :  { %v3261_v37 = vmul.f32 0.0625, %v3259_v23 }
0x123e   :  { %v3262_v26 = vpack.c.bf16 %v3261_v37, %v3261_v37 }
0x1240   :  { %4000 = vmatmul.mubr.bf16.vlgmr.msra.gmra.mrb[36].mxu1 %v3262_v26 }
0x1313   :  { %v3362_v3 = vpop.f32.mrb[36].mxu1 }
0x1314   :  { %v3363_v39 = vadd.f32 %v3362_v3, %v3279_v38  ;;  %v4001_v40 = vpop.f32.mrb[37].mxu1 }
0x1315   :  { %v3365_v9 = vpop.f32.mrb[38].mxu1 }
0x1316   :  { %3368 = vst [vmem:[#allocation25] sm:$0x1] %v3363_v39  ;;  %v4002_v41 = vpop.f32.mrb[39].mxu1 }
0x1317   :  { %4606 = shalt.err (!%p4603_p4)
}
0x1318   :  { %s5513_s3 = sld [smem:[#allocation45_spill]] }
0x131e   :  { %s4607_s8 = scalar_lea.hbm %s5513_s3, 16 }
0x131f   :  { %p4608_p5 = scmp.ne.s32.totalorder %s5513_s3, %s4607_s8  ;;  %p4611_p6 = scmp.lt.u32.totalorder %s4607_s8, %s5513_s3 }
0x1321   :  { %p4613_p7 = pnand %p4611_p6, %p4608_p5 }
0x1323   :  { %4616 = shalt.err (!%p4613_p7)
}
0x1324   :  { %3378 = dma.vmem_to_hbm [thread:$0]  %s3376_s5, 16, %s5513_s3, [#allocation4]  }
0x1325   :  { %4633 = dma.done.wait [#allocation4], 16  }
0x1326   :  { %4634 = vsyncadd [#allocation4], 4294967280 }
0x1327   :  { %3382 = vsyncpa [#allocation3], 1 }
0x1328   :  { %3383 = vsyncpa [#allocation6], 1 }
0x1329   :  { %3384 = vsyncpa [#allocation9], 1 }
0x132a   :  { %3385 = vsyncpa [#allocation12], 1 }
0x132b   :  { %3386 = vsyncpa [#allocation15], 1 }
0x132c   :  { %3387 = vsyncpa [#allocation18], 1 }
0x132d   :  { %3388 = vsyncpa [#allocation21], 1 }
0x132e   :  { %3389 = vsyncpa [#allocation24], 1 }
0x132f   :  { %3390 = vsyncpa [#allocation4], 1 }

</bundles_post_ra>
